<compile_context>
chip_gen: v6e
topology: v6e:2x2x1
jax: 0.10.0
libtpu: 0.0.40
codegen_flags: <defaults>
</compile_context>

<pallas_src>
import numpy as np

import jax
import jax.numpy as jnp
from jax.experimental import pallas as pl
from jax.experimental.pallas import tpu as pltpu

EPS = 1e-5


def _round_up(v, m):
    return (v + m - 1) // m * m


# ---------------------------------------------------------------------------
# Host-side (one-time) folding of conv / pool / flatten into dense operators
# ---------------------------------------------------------------------------
def _conv_dense(w, h_in, pad):
    """Dense operator D with flat_out = flat_in @ D per sample, (c,h,w) c-major."""
    co, ci, kh, kw = w.shape
    h_out = h_in + 2 * pad - kh + 1
    hw_in, hw_out = h_in * h_in, h_out * h_out
    d = np.zeros((ci * hw_in, co * hw_out), np.float32)
    for dh in range(kh):
        for dw in range(kw):
            for ho in range(h_out):
                hi = ho + dh - pad
                if hi < 0 or hi >= h_in:
                    continue
                for wo in range(h_out):
                    wi = wo + dw - pad
                    if wi < 0 or wi >= h_in:
                        continue
                    dst0 = ho * h_out + wo
                    for c_in in range(ci):
                        src = c_in * hw_in + hi * h_in + wi
                        d[src, dst0::hw_out] += w[:, c_in, dh, dw]
    return d


def _pool_dense(c, h_in):
    """Dense 2x2 / stride-2 average-pool (floor mode, like nn.AvgPool2d(2))."""
    h_out = h_in // 2
    hw_in, hw_out = h_in * h_in, h_out * h_out
    d = np.zeros((c * hw_in, c * hw_out), np.float32)
    for ch in range(c):
        for ho in range(h_out):
            for wo in range(h_out):
                dst = ch * hw_out + ho * h_out + wo
                for a in range(2):
                    for b in range(2):
                        src = ch * hw_in + (2 * ho + a) * h_in + (2 * wo + b)
                        d[src, dst] = 0.25
    return d


def _conv1_quad_perm(c, h):
    """Column permutation grouping conv1 outputs into four pool quadrants.

    New layout: [quad(0,0) | quad(0,1) | quad(1,0) | quad(1,1) | leftover],
    each quadrant block in (channel, h_out, w_out) c-major order, so a 2x2
    avg-pool is 0.25*(blk0+blk1+blk2+blk3) on 128-aligned lane slices.
    The leftover (odd row/col) columns only participate in BN1 statistics.
    """
    hp = h // 2
    hw = h * h
    perm = []
    for qh in range(2):
        for qw in range(2):
            for ch in range(c):
                for ho in range(hp):
                    for wo in range(hp):
                        perm.append(ch * hw + (2 * ho + qh) * h + (2 * wo + qw))
    for ch in range(c):
        for hh in range(h):
            for ww in range(h):
                if hh >= 2 * hp or ww >= 2 * hp:
                    perm.append(ch * hw + hh * h + ww)
    assert len(perm) == c * hw
    return np.asarray(perm, np.int64)


def build_operators(m, params):
    c1, c2 = m // 4, m // 2
    h0 = m                           # input spatial size (MxM input implied)
    h1 = h0 + 2 * 2 - 4 + 1          # 17 after conv1 (k=4, pad=2)
    h1p = h1 // 2                    # 8  after avgpool
    h2 = h1p + 2 * 2 - 4 + 1         # 9  after conv2
    h2p = h2 // 2                    # 4  after avgpool
    hw1, hw2 = h1 * h1, h2 * h2
    s1, s2 = c1 * hw1, c2 * hw2                  # 1156, 648 (true widths)
    s1p, s2p = _round_up(s1, 128), _round_up(s2, 128)   # 1280, 768 lane-padded
    quad = c1 * h1p * h1p                        # 256 = one pool-quadrant block
    f1, f2, out_n = 4 * m, 2 * m, 128

    w1 = np.asarray(params["w1"], np.float32)
    w2 = np.asarray(params["w2"], np.float32)
    wf1 = np.asarray(params["wf1"], np.float32)          # torch (out, in)
    wf2 = np.asarray(params["wf2"], np.float32)
    wf3 = np.asarray(params["wf3"], np.float32)
    assert wf1.shape[1] == c2 * h2p * h2p

    # conv1 dense operator with quadrant-permuted, lane-padded output columns.
    perm = _conv1_quad_perm(c1, h1)
    k1 = np.zeros((h0 * h0, s1p), np.float32)
    k1[:, :s1] = _conv_dense(w1, h0, 2)[:, perm]
    chan1 = perm // hw1                                  # channel per column

    # aux1: rows 0..c1-1 = channel indicator, row c1/c1+1 = per-channel
    # gamma/beta packed in the first c1 lanes (padded columns: all-zero).
    aux1 = np.zeros((c1 + 2, s1p), np.float32)
    for ch in range(c1):
        aux1[ch, :s1] = (chan1 == ch).astype(np.float32)
    aux1[c1, :c1] = np.asarray(params["g1"], np.float32)
    aux1[c1 + 1, :c1] = np.asarray(params["be1"], np.float32)

    # conv2 dense operator (input = pooled (c1,8,8) c-major), lane-padded cols.
    k2 = np.zeros((c1 * h1p * h1p, s2p), np.float32)
    k2[:, :s2] = _conv_dense(w2, h1p, 2)

    # avgpool2 ∘ NCHW-flatten ∘ fc1 composed into one operator (all linear;
    # fc1/fc2/conv biases feeding a BatchNorm cancel and are omitted).
    q = np.zeros((s2p, f1), np.float32)
    q[:s2] = _pool_dense(c2, h2) @ wf1.T

    # fc2 + fc3 coalesced into one bf16 slab (static row/col views in-kernel).
    wfc = np.zeros((f1 + f2, out_n), np.float32)
    wfc[:f1, :f2] = wf2.T
    wfc[f1:, :] = wf3.T

    # BN2 indicator + all remaining per-channel / per-feature parameters in a
    # single lane-padded f32 slab (one DMA).
    rows = _round_up(c2 + 7, 8)
    auxfc = np.zeros((rows, s2p), np.float32)
    for ch in range(c2):
        auxfc[ch, ch * hw2:(ch + 1) * hw2] = 1.0
    auxfc[c2, :c2] = np.asarray(params["g2"], np.float32)
    auxfc[c2 + 1, :c2] = np.asarray(params["be2"], np.float32)
    auxfc[c2 + 2, :f1] = np.asarray(params["g3"], np.float32)
    auxfc[c2 + 3, :f1] = np.asarray(params["be3"], np.float32)
    auxfc[c2 + 4, :f2] = np.asarray(params["g4"], np.float32)
    auxfc[c2 + 5, :f2] = np.asarray(params["be4"], np.float32)
    auxfc[c2 + 6, :out_n] = np.asarray(params["bf3"], np.float32)

    bf16 = jnp.bfloat16
    ops = {
        "k1": jnp.asarray(k1, bf16),
        "aux1": jnp.asarray(aux1),
        "k2": jnp.asarray(k2, bf16),
        "q": jnp.asarray(q, bf16),
        "wfc": jnp.asarray(wfc, bf16),
        "auxfc": jnp.asarray(auxfc),
    }
    meta = dict(c1=c1, c2=c2, hw1=hw1, hw2=hw2, quad=quad,
                f1=f1, f2=f2, out_n=out_n)
    return ops, meta


# ---------------------------------------------------------------------------
# Fused Pallas kernel (single invocation, no grid)
# ---------------------------------------------------------------------------
def make_lora_cnn_forward(meta):
    c1, c2 = meta["c1"], meta["c2"]
    hw1, hw2 = meta["hw1"], meta["hw2"]     # true H*W counts (not padded)
    quad = meta["quad"]
    f1, f2, out_n = meta["f1"], meta["f2"], meta["out_n"]

    def kernel(x_ref, k1_ref, aux1_ref,                  # auto-DMA'd VMEM
               k2_hbm, q_hbm, wfc_hbm, auxfc_hbm,        # pl.ANY (HBM)
               o_ref,
               k2_v, q_v, wfc_v, auxfc_v, sem):          # scratch
        f32 = jnp.float32
        n = x_ref.shape[0]

        # Kick off HBM->VMEM copies for everything only needed after conv1/BN1
        # so they overlap the first matmul + BN reductions.
        cp_k2 = pltpu.make_async_copy(k2_hbm, k2_v, sem.at[0])
        cp_ax = pltpu.make_async_copy(auxfc_hbm, auxfc_v, sem.at[1])
        cp_q = pltpu.make_async_copy(q_hbm, q_v, sem.at[2])
        cp_fc = pltpu.make_async_copy(wfc_hbm, wfc_v, sem.at[3])
        cp_k2.start()
        cp_ax.start()
        cp_q.start()
        cp_fc.start()

        def mm(a, w):
            # bf16 MXU operands, f32 accumulate.
            return jnp.dot(a.astype(jnp.bfloat16), w, preferred_element_type=f32)

        def bn2d_relu(y, ind, g_c, b_c, hw):
            # Training-mode BatchNorm2d: per-channel stats over N*H*W, biased
            # variance.  Per-channel gather and per-column broadcast are two
            # tiny f32 matmuls on the otherwise-idle MXU (review item #6);
            # only the cheap batch-axis (sublane) sums stay on the VPU.
            rs = jnp.sum(y, axis=0, keepdims=True)                   # (1, S)
            rss = jnp.sum(y * y, axis=0, keepdims=True)              # (1, S)
            rr = jnp.concatenate([rs, rss], axis=0)                  # (2, S)
            stats = jax.lax.dot_general(                              # (2, C)
                rr, ind, (((1,), (1,)), ((), ())),
                preferred_element_type=f32)
            inv_cnt = 1.0 / (n * hw)
            mean_c = stats[0:1, :] * inv_cnt
            var_c = jnp.maximum(stats[1:2, :] * inv_cnt - mean_c * mean_c, 0.0)
            scale_c = g_c * jax.lax.rsqrt(var_c + EPS)               # gamma folded
            shift_c = b_c - mean_c * scale_c
            cols = jnp.dot(jnp.concatenate([scale_c, shift_c], axis=0), ind,
                           preferred_element_type=f32)               # (2, S)
            return jnp.maximum(y * cols[0:1, :] + cols[1:2, :], 0.0)

        def bn1d_relu(h, g, b):
            # Training-mode BatchNorm1d: per-feature stats over the batch.
            inv_n = 1.0 / n
            mu = jnp.sum(h, axis=0, keepdims=True) * inv_n
            var = jnp.maximum(
                jnp.sum(h * h, axis=0, keepdims=True) * inv_n - mu * mu, 0.0)
            scale = g * jax.lax.rsqrt(var + EPS)
            return jnp.maximum(h * scale + (b - mu * scale), 0.0)

        x = x_ref[...]                                               # (N, 256)

        # conv1 -> BN1 -> ReLU  (conv bias cancels under batch-mean subtraction)
        a1 = bn2d_relu(mm(x, k1_ref[...]),
                       aux1_ref[0:c1, :],
                       aux1_ref[c1:c1 + 1, 0:c1],
                       aux1_ref[c1 + 1:c1 + 2, 0:c1], hw1)           # (N, 1280)

        # 2x2 avg-pool: quadrants are contiguous 128-aligned column blocks, so
        # pooling is three lane-aligned VPU adds + one scale (no pool matrix).
        pool1 = 0.25 * (a1[:, 0:quad] + a1[:, quad:2 * quad]
                        + a1[:, 2 * quad:3 * quad] + a1[:, 3 * quad:4 * quad])

        # conv2 -> BN2 -> ReLU
        cp_k2.wait()
        cp_ax.wait()
        a2 = bn2d_relu(mm(pool1, k2_v[...]),
                       auxfc_v[0:c2, :],
                       auxfc_v[c2:c2 + 1, 0:c2],
                       auxfc_v[c2 + 1:c2 + 2, 0:c2], hw2)            # (N, 768)

        # avgpool2 ∘ NCHW-flatten ∘ fc1 folded into one operator -> BN3 -> ReLU
        cp_q.wait()
        h1 = bn1d_relu(mm(a2, q_v[...]),
                       auxfc_v[c2 + 2:c2 + 3, 0:f1],
                       auxfc_v[c2 + 3:c2 + 4, 0:f1])                 # (N, 4M)

        # fc2 -> BN4 -> ReLU
        cp_fc.wait()
        h2 = bn1d_relu(mm(h1, wfc_v[0:f1, 0:f2]),
                       auxfc_v[c2 + 4:c2 + 5, 0:f2],
                       auxfc_v[c2 + 5:c2 + 6, 0:f2])                 # (N, 2M)

        # fc3 (+ bias, no BN follows) -> lane-dense (N, 128) output
        o_ref[...] = (mm(h2, wfc_v[f1:f1 + f2, :])
                      + auxfc_v[c2 + 6:c2 + 7, 0:out_n])

    vmem = pl.BlockSpec(memory_space=pltpu.MemorySpace.VMEM)
    hbm = pl.BlockSpec(memory_space=pl.ANY)

    def forward(x_nchw, ops):
        n = x_nchw.shape[0]
        x2d = x_nchw.reshape(n, -1)       # NCHW flatten (C=1), c-major layout
        return pl.pallas_call(
            kernel,
            out_shape=jax.ShapeDtypeStruct((n, out_n), jnp.float32),
            in_specs=[vmem, vmem, vmem, hbm, hbm, hbm, hbm],
            out_specs=vmem,
            scratch_shapes=[
                pltpu.VMEM(ops["k2"].shape, jnp.bfloat16),
                pltpu.VMEM(ops["q"].shape, jnp.bfloat16),
                pltpu.VMEM(ops["wfc"].shape, jnp.bfloat16),
                pltpu.VMEM(ops["auxfc"].shape, jnp.float32),
                pltpu.SemaphoreType.DMA((4,)),
            ],
        )(x2d, ops["k1"], ops["aux1"], ops["k2"], ops["q"], ops["wfc"],
          ops["auxfc"])

    return jax.jit(forward)


# ---------------------------------------------------------------------------
# Deterministic parameters in PyTorch layout (shapes from LoRaCNN.__init__)
# ---------------------------------------------------------------------------
def make_params(m, key):
    ks = jax.random.split(key, 20)
    f = jnp.float32

    def rnd(k, shape, scale=0.1):
        return (scale * jax.random.normal(k, shape)).astype(f)

    c1, c2 = m // 4, m // 2
    flat_in = c2 * (m // 4) * (m // 4)
    return {
        # Conv / linear weights in PyTorch layout.  b1/b2/bf1/bf2 are generated
        # for fidelity but are mathematically dead: they cancel exactly under
        # the batch-mean subtraction of the BatchNorm that follows them.
        "w1": rnd(ks[0], (c1, 1, 4, 4)),      "b1": rnd(ks[1], (c1,)),
        "w2": rnd(ks[2], (c2, c1, 4, 4)),     "b2": rnd(ks[3], (c2,)),
        "wf1": rnd(ks[4], (4 * m, flat_in)),  "bf1": rnd(ks[5], (4 * m,)),
        "wf2": rnd(ks[6], (2 * m, 4 * m)),    "bf2": rnd(ks[7], (2 * m,)),
        "wf3": rnd(ks[8], (128, 2 * m)),      "bf3": rnd(ks[9], (128,)),
        # BatchNorm affine params.
        "g1": 1.0 + rnd(ks[10], (c1,)),       "be1": rnd(ks[11], (c1,)),
        "g2": 1.0 + rnd(ks[12], (c2,)),       "be2": rnd(ks[13], (c2,)),
        "g3": 1.0 + rnd(ks[14], (4 * m,)),    "be3": rnd(ks[15], (4 * m,)),
        "g4": 1.0 + rnd(ks[16], (2 * m,)),    "be4": rnd(ks[17], (2 * m,)),
    }


if __name__ == "__main__":
    M = 16          # fc1 input = M//2 * (M//4)**2 = 128  => input spatial MxM
    N = 2           # batch

    key = jax.random.PRNGKey(0)
    kx, kp = jax.random.split(key)
    params = make_params(M, kp)
    ops, meta = build_operators(M, params)
    fwd = make_lora_cnn_forward(meta)

    x = jax.random.normal(kx, (N, 1, M, M), jnp.float32)     # NCHW, like PyTorch
    out = fwd(x, ops)
    jax.block_until_ready(out)

    assert out.shape == (N, 128), out.shape
    assert out.dtype == jnp.float32
    assert bool(jnp.all(jnp.isfinite(out)))
    print("KERNEL_OK")
</pallas_src>

<mosaic_0001>
module attributes {stable_mosaic.version = 11 : i64} {
  func.func @kernel(%arg0: memref<2x256xf32, #tpu.memory_space<vmem>>, %arg1: memref<256x1280xbf16, #tpu.memory_space<vmem>>, %arg2: memref<6x1280xf32, #tpu.memory_space<vmem>>, %arg3: memref<256x768xbf16, #tpu.memory_space<any>>, %arg4: memref<768x64xbf16, #tpu.memory_space<any>>, %arg5: memref<96x128xbf16, #tpu.memory_space<any>>, %arg6: memref<16x768xf32, #tpu.memory_space<any>>, %arg7: memref<2x128xf32, #tpu.memory_space<vmem>>, %arg8: memref<256x768xbf16, #tpu.memory_space<vmem>>, %arg9: memref<768x64xbf16, #tpu.memory_space<vmem>>, %arg10: memref<96x128xbf16, #tpu.memory_space<vmem>>, %arg11: memref<16x768xf32, #tpu.memory_space<vmem>>, %arg12: memref<4x!tpu.dma_semaphore, #tpu.memory_space<semaphore_mem>>) attributes {dimension_semantics = [], scalar_prefetch = 0 : i64, scratch_operands = 5 : i64, tpu.core_type = #tpu.core_type<tc>} {
    %c0_i32 = arith.constant 0 : i32
    %0 = tpu.memref_slice %arg12[%c0_i32] : memref<4x!tpu.dma_semaphore, #tpu.memory_space<semaphore_mem>> -> memref<1x!tpu.dma_semaphore, #tpu.memory_space<semaphore_mem>>
    %1 = tpu.memref_squeeze %0 : memref<1x!tpu.dma_semaphore, #tpu.memory_space<semaphore_mem>> -> memref<!tpu.dma_semaphore, #tpu.memory_space<semaphore_mem>>
    tpu.enqueue_dma source(%arg3 : memref<256x768xbf16, #tpu.memory_space<any>>) target(%arg8 : memref<256x768xbf16, #tpu.memory_space<vmem>>) target_semaphore(%1 : memref<!tpu.dma_semaphore, #tpu.memory_space<semaphore_mem>>)
    %c1_i32 = arith.constant 1 : i32
    %2 = tpu.memref_slice %arg12[%c1_i32] : memref<4x!tpu.dma_semaphore, #tpu.memory_space<semaphore_mem>> -> memref<1x!tpu.dma_semaphore, #tpu.memory_space<semaphore_mem>>
    %3 = tpu.memref_squeeze %2 : memref<1x!tpu.dma_semaphore, #tpu.memory_space<semaphore_mem>> -> memref<!tpu.dma_semaphore, #tpu.memory_space<semaphore_mem>>
    tpu.enqueue_dma source(%arg6 : memref<16x768xf32, #tpu.memory_space<any>>) target(%arg11 : memref<16x768xf32, #tpu.memory_space<vmem>>) target_semaphore(%3 : memref<!tpu.dma_semaphore, #tpu.memory_space<semaphore_mem>>)
    %c2_i32 = arith.constant 2 : i32
    %4 = tpu.memref_slice %arg12[%c2_i32] : memref<4x!tpu.dma_semaphore, #tpu.memory_space<semaphore_mem>> -> memref<1x!tpu.dma_semaphore, #tpu.memory_space<semaphore_mem>>
    %5 = tpu.memref_squeeze %4 : memref<1x!tpu.dma_semaphore, #tpu.memory_space<semaphore_mem>> -> memref<!tpu.dma_semaphore, #tpu.memory_space<semaphore_mem>>
    tpu.enqueue_dma source(%arg4 : memref<768x64xbf16, #tpu.memory_space<any>>) target(%arg9 : memref<768x64xbf16, #tpu.memory_space<vmem>>) target_semaphore(%5 : memref<!tpu.dma_semaphore, #tpu.memory_space<semaphore_mem>>)
    %c3_i32 = arith.constant 3 : i32
    %6 = tpu.memref_slice %arg12[%c3_i32] : memref<4x!tpu.dma_semaphore, #tpu.memory_space<semaphore_mem>> -> memref<1x!tpu.dma_semaphore, #tpu.memory_space<semaphore_mem>>
    %7 = tpu.memref_squeeze %6 : memref<1x!tpu.dma_semaphore, #tpu.memory_space<semaphore_mem>> -> memref<!tpu.dma_semaphore, #tpu.memory_space<semaphore_mem>>
    tpu.enqueue_dma source(%arg5 : memref<96x128xbf16, #tpu.memory_space<any>>) target(%arg10 : memref<96x128xbf16, #tpu.memory_space<vmem>>) target_semaphore(%7 : memref<!tpu.dma_semaphore, #tpu.memory_space<semaphore_mem>>)
    %c0 = arith.constant 0 : index
    %c0_0 = arith.constant 0 : index
    %8 = vector.load %arg0[%c0, %c0_0] : memref<2x256xf32, #tpu.memory_space<vmem>>, vector<2x256xf32>
    %c0_1 = arith.constant 0 : index
    %c0_2 = arith.constant 0 : index
    %9 = vector.load %arg1[%c0_1, %c0_2] : memref<256x1280xbf16, #tpu.memory_space<vmem>>, vector<256x1280xbf16>
    %10 = arith.truncf %8 : vector<2x256xf32> to vector<2x256xbf16>
    %cst = arith.constant dense<0.000000e+00> : vector<2x1280xf32>
    %11 = tpu.matmul %10, %9, %cst {dimension_numbers = #tpu.dot_dimension_numbers<[1], [0], [0], [1], [0, 0, 1, 1], [], []>} : vector<2x256xbf16>, vector<256x1280xbf16>, vector<2x1280xf32> -> vector<2x1280xf32>
    %c0_3 = arith.constant 0 : index
    %c0_4 = arith.constant 0 : index
    %12 = vector.load %arg2[%c0_3, %c0_4] : memref<6x1280xf32, #tpu.memory_space<vmem>>, vector<4x1280xf32>
    %c4 = arith.constant 4 : index
    %c0_5 = arith.constant 0 : index
    %13 = vector.load %arg2[%c4, %c0_5] : memref<6x1280xf32, #tpu.memory_space<vmem>>, vector<1x4xf32>
    %c5 = arith.constant 5 : index
    %c0_6 = arith.constant 0 : index
    %14 = vector.load %arg2[%c5, %c0_6] : memref<6x1280xf32, #tpu.memory_space<vmem>>, vector<1x4xf32>
    %cst_7 = arith.constant dense<0.000000e+00> : vector<1280xf32>
    %15 = vector.multi_reduction <add>, %11, %cst_7 [0] : vector<2x1280xf32> to vector<1280xf32>
    %16 = vector.shape_cast %15 : vector<1280xf32> to vector<1x1280xf32>
    %17 = arith.mulf %11, %11 : vector<2x1280xf32>
    %cst_8 = arith.constant dense<0.000000e+00> : vector<1280xf32>
    %18 = vector.multi_reduction <add>, %17, %cst_8 [0] : vector<2x1280xf32> to vector<1280xf32>
    %19 = vector.shape_cast %18 : vector<1280xf32> to vector<1x1280xf32>
    %20 = tpu.concatenate %16, %19 in 0 : vector<1x1280xf32>, vector<1x1280xf32> -> vector<2x1280xf32>
    %cst_9 = arith.constant dense<0.000000e+00> : vector<2x4xf32>
    %21 = tpu.matmul %20, %12, %cst_9 {dimension_numbers = #tpu.dot_dimension_numbers<[1], [1], [0], [0], [0, 0, 1, 0], [], []>} : vector<2x1280xf32>, vector<4x1280xf32>, vector<2x4xf32> -> vector<2x4xf32>
    %22 = vector.extract_strided_slice %21 {offsets = [0, 0], sizes = [1, 4], strides = [1, 1]} : vector<2x4xf32> to vector<1x4xf32>
    %cst_10 = arith.constant 0.00173010386 : f32
    %23 = vector.broadcast %cst_10 : f32 to vector<1x4xf32>
    %24 = arith.mulf %22, %23 : vector<1x4xf32>
    %25 = vector.extract_strided_slice %21 {offsets = [1, 0], sizes = [1, 4], strides = [1, 1]} : vector<2x4xf32> to vector<1x4xf32>
    %cst_11 = arith.constant 0.00173010386 : f32
    %26 = vector.broadcast %cst_11 : f32 to vector<1x4xf32>
    %27 = arith.mulf %25, %26 : vector<1x4xf32>
    %28 = arith.mulf %24, %24 : vector<1x4xf32>
    %29 = arith.subf %27, %28 : vector<1x4xf32>
    %cst_12 = arith.constant 0.000000e+00 : f32
    %30 = vector.broadcast %cst_12 : f32 to vector<1x4xf32>
    %31 = arith.maximumf %29, %30 : vector<1x4xf32>
    %cst_13 = arith.constant 9.99999974E-6 : f32
    %32 = vector.broadcast %cst_13 : f32 to vector<1x4xf32>
    %33 = arith.addf %31, %32 : vector<1x4xf32>
    %34 = math.rsqrt %33 : vector<1x4xf32>
    %35 = arith.mulf %13, %34 : vector<1x4xf32>
    %36 = arith.mulf %24, %35 : vector<1x4xf32>
    %37 = arith.subf %14, %36 : vector<1x4xf32>
    %38 = tpu.concatenate %35, %37 in 0 : vector<1x4xf32>, vector<1x4xf32> -> vector<2x4xf32>
    %cst_14 = arith.constant dense<0.000000e+00> : vector<2x1280xf32>
    %39 = tpu.matmul %38, %12, %cst_14 {dimension_numbers = #tpu.dot_dimension_numbers<[1], [0], [0], [1], [0, 0, 1, 1], [], []>} : vector<2x4xf32>, vector<4x1280xf32>, vector<2x1280xf32> -> vector<2x1280xf32>
    %40 = vector.extract_strided_slice %39 {offsets = [0, 0], sizes = [1, 1280], strides = [1, 1]} : vector<2x1280xf32> to vector<1x1280xf32>
    %41 = vector.broadcast %40 : vector<1x1280xf32> to vector<2x1280xf32>
    %42 = arith.mulf %11, %41 : vector<2x1280xf32>
    %43 = vector.extract_strided_slice %39 {offsets = [1, 0], sizes = [1, 1280], strides = [1, 1]} : vector<2x1280xf32> to vector<1x1280xf32>
    %44 = vector.broadcast %43 : vector<1x1280xf32> to vector<2x1280xf32>
    %45 = arith.addf %42, %44 : vector<2x1280xf32>
    %cst_15 = arith.constant 0.000000e+00 : f32
    %46 = vector.broadcast %cst_15 : f32 to vector<2x1280xf32>
    %47 = arith.maximumf %45, %46 : vector<2x1280xf32>
    %48 = vector.extract_strided_slice %47 {offsets = [0, 0], sizes = [2, 256], strides = [1, 1]} : vector<2x1280xf32> to vector<2x256xf32>
    %49 = vector.extract_strided_slice %47 {offsets = [0, 256], sizes = [2, 256], strides = [1, 1]} : vector<2x1280xf32> to vector<2x256xf32>
    %50 = arith.addf %48, %49 : vector<2x256xf32>
    %51 = vector.extract_strided_slice %47 {offsets = [0, 512], sizes = [2, 256], strides = [1, 1]} : vector<2x1280xf32> to vector<2x256xf32>
    %52 = arith.addf %50, %51 : vector<2x256xf32>
    %53 = vector.extract_strided_slice %47 {offsets = [0, 768], sizes = [2, 256], strides = [1, 1]} : vector<2x1280xf32> to vector<2x256xf32>
    %54 = arith.addf %52, %53 : vector<2x256xf32>
    %cst_16 = arith.constant 2.500000e-01 : f32
    %55 = vector.broadcast %cst_16 : f32 to vector<2x256xf32>
    %56 = arith.mulf %55, %54 : vector<2x256xf32>
    %c0_i32_17 = arith.constant 0 : i32
    %57 = tpu.memref_slice %arg12[%c0_i32_17] : memref<4x!tpu.dma_semaphore, #tpu.memory_space<semaphore_mem>> -> memref<1x!tpu.dma_semaphore, #tpu.memory_space<semaphore_mem>>
    %58 = tpu.memref_squeeze %57 : memref<1x!tpu.dma_semaphore, #tpu.memory_space<semaphore_mem>> -> memref<!tpu.dma_semaphore, #tpu.memory_space<semaphore_mem>>
    tpu.wait_dma2 semaphore(%58 : memref<!tpu.dma_semaphore, #tpu.memory_space<semaphore_mem>>) src(%arg3 : memref<256x768xbf16, #tpu.memory_space<any>>) dst(%arg8 : memref<256x768xbf16, #tpu.memory_space<vmem>>)
    %c1_i32_18 = arith.constant 1 : i32
    %59 = tpu.memref_slice %arg12[%c1_i32_18] : memref<4x!tpu.dma_semaphore, #tpu.memory_space<semaphore_mem>> -> memref<1x!tpu.dma_semaphore, #tpu.memory_space<semaphore_mem>>
    %60 = tpu.memref_squeeze %59 : memref<1x!tpu.dma_semaphore, #tpu.memory_space<semaphore_mem>> -> memref<!tpu.dma_semaphore, #tpu.memory_space<semaphore_mem>>
    tpu.wait_dma2 semaphore(%60 : memref<!tpu.dma_semaphore, #tpu.memory_space<semaphore_mem>>) src(%arg6 : memref<16x768xf32, #tpu.memory_space<any>>) dst(%arg11 : memref<16x768xf32, #tpu.memory_space<vmem>>)
    %c0_19 = arith.constant 0 : index
    %c0_20 = arith.constant 0 : index
    %61 = vector.load %arg8[%c0_19, %c0_20] : memref<256x768xbf16, #tpu.memory_space<vmem>>, vector<256x768xbf16>
    %62 = arith.truncf %56 : vector<2x256xf32> to vector<2x256xbf16>
    %cst_21 = arith.constant dense<0.000000e+00> : vector<2x768xf32>
    %63 = tpu.matmul %62, %61, %cst_21 {dimension_numbers = #tpu.dot_dimension_numbers<[1], [0], [0], [1], [0, 0, 1, 1], [], []>} : vector<2x256xbf16>, vector<256x768xbf16>, vector<2x768xf32> -> vector<2x768xf32>
    %c0_22 = arith.constant 0 : index
    %c0_23 = arith.constant 0 : index
    %64 = vector.load %arg11[%c0_22, %c0_23] : memref<16x768xf32, #tpu.memory_space<vmem>>, vector<8x768xf32>
    %c8 = arith.constant 8 : index
    %c0_24 = arith.constant 0 : index
    %65 = vector.load %arg11[%c8, %c0_24] : memref<16x768xf32, #tpu.memory_space<vmem>>, vector<1x8xf32>
    %c9 = arith.constant 9 : index
    %c0_25 = arith.constant 0 : index
    %66 = vector.load %arg11[%c9, %c0_25] : memref<16x768xf32, #tpu.memory_space<vmem>>, vector<1x8xf32>
    %cst_26 = arith.constant dense<0.000000e+00> : vector<768xf32>
    %67 = vector.multi_reduction <add>, %63, %cst_26 [0] : vector<2x768xf32> to vector<768xf32>
    %68 = vector.shape_cast %67 : vector<768xf32> to vector<1x768xf32>
    %69 = arith.mulf %63, %63 : vector<2x768xf32>
    %cst_27 = arith.constant dense<0.000000e+00> : vector<768xf32>
    %70 = vector.multi_reduction <add>, %69, %cst_27 [0] : vector<2x768xf32> to vector<768xf32>
    %71 = vector.shape_cast %70 : vector<768xf32> to vector<1x768xf32>
    %72 = tpu.concatenate %68, %71 in 0 : vector<1x768xf32>, vector<1x768xf32> -> vector<2x768xf32>
    %cst_28 = arith.constant dense<0.000000e+00> : vector<2x8xf32>
    %73 = tpu.matmul %72, %64, %cst_28 {dimension_numbers = #tpu.dot_dimension_numbers<[1], [1], [0], [0], [0, 0, 1, 0], [], []>} : vector<2x768xf32>, vector<8x768xf32>, vector<2x8xf32> -> vector<2x8xf32>
    %74 = vector.extract_strided_slice %73 {offsets = [0, 0], sizes = [1, 8], strides = [1, 1]} : vector<2x8xf32> to vector<1x8xf32>
    %cst_29 = arith.constant 0.00617283955 : f32
    %75 = vector.broadcast %cst_29 : f32 to vector<1x8xf32>
    %76 = arith.mulf %74, %75 : vector<1x8xf32>
    %77 = vector.extract_strided_slice %73 {offsets = [1, 0], sizes = [1, 8], strides = [1, 1]} : vector<2x8xf32> to vector<1x8xf32>
    %cst_30 = arith.constant 0.00617283955 : f32
    %78 = vector.broadcast %cst_30 : f32 to vector<1x8xf32>
    %79 = arith.mulf %77, %78 : vector<1x8xf32>
    %80 = arith.mulf %76, %76 : vector<1x8xf32>
    %81 = arith.subf %79, %80 : vector<1x8xf32>
    %cst_31 = arith.constant 0.000000e+00 : f32
    %82 = vector.broadcast %cst_31 : f32 to vector<1x8xf32>
    %83 = arith.maximumf %81, %82 : vector<1x8xf32>
    %cst_32 = arith.constant 9.99999974E-6 : f32
    %84 = vector.broadcast %cst_32 : f32 to vector<1x8xf32>
    %85 = arith.addf %83, %84 : vector<1x8xf32>
    %86 = math.rsqrt %85 : vector<1x8xf32>
    %87 = arith.mulf %65, %86 : vector<1x8xf32>
    %88 = arith.mulf %76, %87 : vector<1x8xf32>
    %89 = arith.subf %66, %88 : vector<1x8xf32>
    %90 = tpu.concatenate %87, %89 in 0 : vector<1x8xf32>, vector<1x8xf32> -> vector<2x8xf32>
    %cst_33 = arith.constant dense<0.000000e+00> : vector<2x768xf32>
    %91 = tpu.matmul %90, %64, %cst_33 {dimension_numbers = #tpu.dot_dimension_numbers<[1], [0], [0], [1], [0, 0, 1, 1], [], []>} : vector<2x8xf32>, vector<8x768xf32>, vector<2x768xf32> -> vector<2x768xf32>
    %92 = vector.extract_strided_slice %91 {offsets = [0, 0], sizes = [1, 768], strides = [1, 1]} : vector<2x768xf32> to vector<1x768xf32>
    %93 = vector.broadcast %92 : vector<1x768xf32> to vector<2x768xf32>
    %94 = arith.mulf %63, %93 : vector<2x768xf32>
    %95 = vector.extract_strided_slice %91 {offsets = [1, 0], sizes = [1, 768], strides = [1, 1]} : vector<2x768xf32> to vector<1x768xf32>
    %96 = vector.broadcast %95 : vector<1x768xf32> to vector<2x768xf32>
    %97 = arith.addf %94, %96 : vector<2x768xf32>
    %cst_34 = arith.constant 0.000000e+00 : f32
    %98 = vector.broadcast %cst_34 : f32 to vector<2x768xf32>
    %99 = arith.maximumf %97, %98 : vector<2x768xf32>
    %c2_i32_35 = arith.constant 2 : i32
    %100 = tpu.memref_slice %arg12[%c2_i32_35] : memref<4x!tpu.dma_semaphore, #tpu.memory_space<semaphore_mem>> -> memref<1x!tpu.dma_semaphore, #tpu.memory_space<semaphore_mem>>
    %101 = tpu.memref_squeeze %100 : memref<1x!tpu.dma_semaphore, #tpu.memory_space<semaphore_mem>> -> memref<!tpu.dma_semaphore, #tpu.memory_space<semaphore_mem>>
    tpu.wait_dma2 semaphore(%101 : memref<!tpu.dma_semaphore, #tpu.memory_space<semaphore_mem>>) src(%arg4 : memref<768x64xbf16, #tpu.memory_space<any>>) dst(%arg9 : memref<768x64xbf16, #tpu.memory_space<vmem>>)
    %c0_36 = arith.constant 0 : index
    %c0_37 = arith.constant 0 : index
    %102 = vector.load %arg9[%c0_36, %c0_37] : memref<768x64xbf16, #tpu.memory_space<vmem>>, vector<768x64xbf16>
    %103 = arith.truncf %99 : vector<2x768xf32> to vector<2x768xbf16>
    %cst_38 = arith.constant dense<0.000000e+00> : vector<2x64xf32>
    %104 = tpu.matmul %103, %102, %cst_38 {dimension_numbers = #tpu.dot_dimension_numbers<[1], [0], [0], [1], [0, 0, 1, 1], [], []>} : vector<2x768xbf16>, vector<768x64xbf16>, vector<2x64xf32> -> vector<2x64xf32>
    %c10 = arith.constant 10 : index
    %c0_39 = arith.constant 0 : index
    %105 = vector.load %arg11[%c10, %c0_39] : memref<16x768xf32, #tpu.memory_space<vmem>>, vector<1x64xf32>
    %c11 = arith.constant 11 : index
    %c0_40 = arith.constant 0 : index
    %106 = vector.load %arg11[%c11, %c0_40] : memref<16x768xf32, #tpu.memory_space<vmem>>, vector<1x64xf32>
    %cst_41 = arith.constant dense<0.000000e+00> : vector<64xf32>
    %107 = vector.multi_reduction <add>, %104, %cst_41 [0] : vector<2x64xf32> to vector<64xf32>
    %108 = vector.shape_cast %107 : vector<64xf32> to vector<1x64xf32>
    %cst_42 = arith.constant 5.000000e-01 : f32
    %109 = vector.broadcast %cst_42 : f32 to vector<1x64xf32>
    %110 = arith.mulf %108, %109 : vector<1x64xf32>
    %111 = arith.mulf %104, %104 : vector<2x64xf32>
    %cst_43 = arith.constant dense<0.000000e+00> : vector<64xf32>
    %112 = vector.multi_reduction <add>, %111, %cst_43 [0] : vector<2x64xf32> to vector<64xf32>
    %113 = vector.shape_cast %112 : vector<64xf32> to vector<1x64xf32>
    %cst_44 = arith.constant 5.000000e-01 : f32
    %114 = vector.broadcast %cst_44 : f32 to vector<1x64xf32>
    %115 = arith.mulf %113, %114 : vector<1x64xf32>
    %116 = arith.mulf %110, %110 : vector<1x64xf32>
    %117 = arith.subf %115, %116 : vector<1x64xf32>
    %cst_45 = arith.constant 0.000000e+00 : f32
    %118 = vector.broadcast %cst_45 : f32 to vector<1x64xf32>
    %119 = arith.maximumf %117, %118 : vector<1x64xf32>
    %cst_46 = arith.constant 9.99999974E-6 : f32
    %120 = vector.broadcast %cst_46 : f32 to vector<1x64xf32>
    %121 = arith.addf %119, %120 : vector<1x64xf32>
    %122 = math.rsqrt %121 : vector<1x64xf32>
    %123 = arith.mulf %105, %122 : vector<1x64xf32>
    %124 = vector.broadcast %123 : vector<1x64xf32> to vector<2x64xf32>
    %125 = arith.mulf %104, %124 : vector<2x64xf32>
    %126 = arith.mulf %110, %123 : vector<1x64xf32>
    %127 = arith.subf %106, %126 : vector<1x64xf32>
    %128 = vector.broadcast %127 : vector<1x64xf32> to vector<2x64xf32>
    %129 = arith.addf %125, %128 : vector<2x64xf32>
    %cst_47 = arith.constant 0.000000e+00 : f32
    %130 = vector.broadcast %cst_47 : f32 to vector<2x64xf32>
    %131 = arith.maximumf %129, %130 : vector<2x64xf32>
    %c3_i32_48 = arith.constant 3 : i32
    %132 = tpu.memref_slice %arg12[%c3_i32_48] : memref<4x!tpu.dma_semaphore, #tpu.memory_space<semaphore_mem>> -> memref<1x!tpu.dma_semaphore, #tpu.memory_space<semaphore_mem>>
    %133 = tpu.memref_squeeze %132 : memref<1x!tpu.dma_semaphore, #tpu.memory_space<semaphore_mem>> -> memref<!tpu.dma_semaphore, #tpu.memory_space<semaphore_mem>>
    tpu.wait_dma2 semaphore(%133 : memref<!tpu.dma_semaphore, #tpu.memory_space<semaphore_mem>>) src(%arg5 : memref<96x128xbf16, #tpu.memory_space<any>>) dst(%arg10 : memref<96x128xbf16, #tpu.memory_space<vmem>>)
    %c0_49 = arith.constant 0 : index
    %c0_50 = arith.constant 0 : index
    %134 = vector.load %arg10[%c0_49, %c0_50] : memref<96x128xbf16, #tpu.memory_space<vmem>>, vector<64x32xbf16>
    %135 = arith.truncf %131 : vector<2x64xf32> to vector<2x64xbf16>
    %cst_51 = arith.constant dense<0.000000e+00> : vector<2x32xf32>
    %136 = tpu.matmul %135, %134, %cst_51 {dimension_numbers = #tpu.dot_dimension_numbers<[1], [0], [0], [1], [0, 0, 1, 1], [], []>} : vector<2x64xbf16>, vector<64x32xbf16>, vector<2x32xf32> -> vector<2x32xf32>
    %c12 = arith.constant 12 : index
    %c0_52 = arith.constant 0 : index
    %137 = vector.load %arg11[%c12, %c0_52] : memref<16x768xf32, #tpu.memory_space<vmem>>, vector<1x32xf32>
    %c13 = arith.constant 13 : index
    %c0_53 = arith.constant 0 : index
    %138 = vector.load %arg11[%c13, %c0_53] : memref<16x768xf32, #tpu.memory_space<vmem>>, vector<1x32xf32>
    %cst_54 = arith.constant dense<0.000000e+00> : vector<32xf32>
    %139 = vector.multi_reduction <add>, %136, %cst_54 [0] : vector<2x32xf32> to vector<32xf32>
    %140 = vector.shape_cast %139 : vector<32xf32> to vector<1x32xf32>
    %cst_55 = arith.constant 5.000000e-01 : f32
    %141 = vector.broadcast %cst_55 : f32 to vector<1x32xf32>
    %142 = arith.mulf %140, %141 : vector<1x32xf32>
    %143 = arith.mulf %136, %136 : vector<2x32xf32>
    %cst_56 = arith.constant dense<0.000000e+00> : vector<32xf32>
    %144 = vector.multi_reduction <add>, %143, %cst_56 [0] : vector<2x32xf32> to vector<32xf32>
    %145 = vector.shape_cast %144 : vector<32xf32> to vector<1x32xf32>
    %cst_57 = arith.constant 5.000000e-01 : f32
    %146 = vector.broadcast %cst_57 : f32 to vector<1x32xf32>
    %147 = arith.mulf %145, %146 : vector<1x32xf32>
    %148 = arith.mulf %142, %142 : vector<1x32xf32>
    %149 = arith.subf %147, %148 : vector<1x32xf32>
    %cst_58 = arith.constant 0.000000e+00 : f32
    %150 = vector.broadcast %cst_58 : f32 to vector<1x32xf32>
    %151 = arith.maximumf %149, %150 : vector<1x32xf32>
    %cst_59 = arith.constant 9.99999974E-6 : f32
    %152 = vector.broadcast %cst_59 : f32 to vector<1x32xf32>
    %153 = arith.addf %151, %152 : vector<1x32xf32>
    %154 = math.rsqrt %153 : vector<1x32xf32>
    %155 = arith.mulf %137, %154 : vector<1x32xf32>
    %156 = vector.broadcast %155 : vector<1x32xf32> to vector<2x32xf32>
    %157 = arith.mulf %136, %156 : vector<2x32xf32>
    %158 = arith.mulf %142, %155 : vector<1x32xf32>
    %159 = arith.subf %138, %158 : vector<1x32xf32>
    %160 = vector.broadcast %159 : vector<1x32xf32> to vector<2x32xf32>
    %161 = arith.addf %157, %160 : vector<2x32xf32>
    %cst_60 = arith.constant 0.000000e+00 : f32
    %162 = vector.broadcast %cst_60 : f32 to vector<2x32xf32>
    %163 = arith.maximumf %161, %162 : vector<2x32xf32>
    %c64 = arith.constant 64 : index
    %c0_61 = arith.constant 0 : index
    %164 = vector.load %arg10[%c64, %c0_61] : memref<96x128xbf16, #tpu.memory_space<vmem>>, vector<32x128xbf16>
    %165 = arith.truncf %163 : vector<2x32xf32> to vector<2x32xbf16>
    %cst_62 = arith.constant dense<0.000000e+00> : vector<2x128xf32>
    %166 = tpu.matmul %165, %164, %cst_62 {dimension_numbers = #tpu.dot_dimension_numbers<[1], [0], [0], [1], [0, 0, 1, 1], [], []>} : vector<2x32xbf16>, vector<32x128xbf16>, vector<2x128xf32> -> vector<2x128xf32>
    %c14 = arith.constant 14 : index
    %c0_63 = arith.constant 0 : index
    %167 = vector.load %arg11[%c14, %c0_63] : memref<16x768xf32, #tpu.memory_space<vmem>>, vector<1x128xf32>
    %168 = vector.broadcast %167 : vector<1x128xf32> to vector<2x128xf32>
    %169 = arith.addf %166, %168 : vector<2x128xf32>
    %c0_64 = arith.constant 0 : index
    %c0_65 = arith.constant 0 : index
    %170 = vector.load %arg7[%c0_64, %c0_65] : memref<2x128xf32, #tpu.memory_space<vmem>>, vector<2x128xf32>
    tpu.vector_store %arg7[%c0_64, %c0_65], %169 {strides = array<i32>} : memref<2x128xf32, #tpu.memory_space<vmem>>, vector<2x128xf32>,
    return
  }
}

</mosaic_0001>

<bundles_post_ra>
// kernel: forward.1
= control target key start
LH: loop header
LB: loop body
LE: loop exit
PB: predicated region body
PF: predicated region fallthrough
CT: control target
= control target key end

     0   :  { %12 = vsyncpa [#allocation8], 0  ;;  %s6073_s0 = inlined_call_operand.vmem [shape: f32[2,256], index: 0, kind: input, shape index: {}]   ;;  %s6074_s1 = inlined_call_operand.hbm [shape: bf16[256,1280], index: 1, kind: input, shape index: {}]   ;;  %s6075_s2 = inlined_call_operand.vmem [shape: f32[6,1280], index: 2, kind: input, shape index: {}]   ;;  %s6076_s3 = inlined_call_operand.hbm [shape: bf16[256,768], index: 3, kind: input, shape index: {}]   ;;  %s6077_s4 = inlined_call_operand.vmem [shape: bf16[768,64], index: 4, kind: input, shape index: {}]   ;;  %s6078_s5 = inlined_call_operand.vmem [shape: bf16[96,128], index: 5, kind: input, shape index: {}]   ;;  %s6079_s6 = inlined_call_operand.vmem [shape: f32[16,768], index: 6, kind: input, shape index: {}]   ;;  %s6080_s7 = inlined_call_operand.hbm [shape: f32[2,128], index: 7, kind: output, shape index: {}]  }
   0x1   :  { %13 = vsyncpa [#allocation9], 0  ;;  %s5496_s24 = smov [#allocation7]  }
   0x2   :  { %s21_s25 = sshll.u32 %s5496_s24, 4  ;;  %s22_s25 = int_to_ptr.vmem [resolvable:$true] %s21_s25 }
   0x3   :  { %s5432_s26 = scalar_lea.vmem %s22_s25, 20480  ;;  %p5437_p1 = scmp.lt.s32.totalorder %s22_s25, %s22_s25 }
   0x4   :  { %p5433_p0 = scmp.ne.s32.totalorder %s22_s25, %s5432_s26  ;;  %p5438_p2 = scmp.lt.s32.totalorder %s5432_s26, %s5432_s26 }
   0x6   :  { %p5439_p3 = por %p5438_p2, %p5437_p1 }
   0x8   :  { %p5440_p4 = pnand %p5439_p3, %p5433_p0 }
   0xa   :  { %5443 = shalt.err (!%p5440_p4)
}
   0xb   :  { %s5497_s27 = smov 640   ;;  %s5498_s28 = smov 40  }
   0xc   :  { %27 = dma.hbm_to_vmem [thread:$0]  %s6074_s1, 20480, %s22_s25, [#allocation8], %s5497_s27, %s5497_s27, %s5498_s28  }
   0xd   :  { %5484 = dma.done.wait [#allocation8], 20480  }
   0xe   :  { %5485 = vsyncadd [#allocation8], 4294946816  ;;  %s5499_s8 = smov [#allocation2]  }
   0xf   :  { %s41_s9 = sshll.u32 %s5499_s8, 4  ;;  %s42_s9 = int_to_ptr.vmem [resolvable:$true] %s41_s9 }
  0x10   :  { %s5452_s10 = scalar_lea.vmem %s42_s9, 12288  ;;  %p5457_p6 = scmp.lt.s32.totalorder %s42_s9, %s42_s9 }
  0x11   :  { %p5453_p5 = scmp.ne.s32.totalorder %s42_s9, %s5452_s10  ;;  %p5458_p7 = scmp.lt.s32.totalorder %s5452_s10, %s5452_s10 }
  0x13   :  { %p5459_p8 = por %p5458_p7, %p5457_p6 }
  0x15   :  { %p5460_p9 = pnand %p5459_p8, %p5453_p5 }
  0x17   :  { %5463 = shalt.err (!%p5460_p9)  }
  0x18   :  { %44 = dma.hbm_to_vmem [thread:$0]  %s6076_s3, 12288, %s42_s9, [#allocation6]  ;;  %v79_v0 = vld [vmem:[%s6079_s6] sm:$0xff]  ;;  %v81_v1 = vld [vmem:[%s6079_s6 + $0x8] sm:$0xff]  ;;  %v83_v2 = vld [vmem:[%s6079_s6 + $0x10] sm:$0xff] }
  0x19   :  { %80 = vst [vmem:[#allocation5] sm:$0xff] %v79_v0  ;;  %82 = vst [vmem:[#allocation5 + $0x8] sm:$0xff] %v81_v1  ;;  %v85_v3 = vld [vmem:[%s6079_s6 + $0x18] sm:$0xff]  ;;  %v87_v4 = vld [vmem:[%s6079_s6 + $0x20] sm:$0xff] }
  0x1a   :  { %84 = vst [vmem:[#allocation5 + $0x10] sm:$0xff] %v83_v2  ;;  %v89_v5 = vld [vmem:[%s6079_s6 + $0x28] sm:$0xff]  ;;  %86 = vst [vmem:[#allocation5 + $0x18] sm:$0xff] %v85_v3  ;;  %v91_v6 = vld [vmem:[%s6079_s6 + $0x30] sm:$0xff] }
  0x1b   :  { %88 = vst [vmem:[#allocation5 + $0x20] sm:$0xff] %v87_v4  ;;  %90 = vst [vmem:[#allocation5 + $0x28] sm:$0xff] %v89_v5 }
  0x1c   :  { %92 = vst [vmem:[#allocation5 + $0x30] sm:$0xff] %v91_v6 }
  0x1d   :  { %110 = vsyncadd [#allocation6 + $0x1], 1536  ;;  %v145_v7 = vld [vmem:[%s6077_s4] sm:$0xff]  ;;  %v147_v8 = vld [vmem:[%s6077_s4 + $0x8] sm:$0xff] }
  0x1e   :  { %146 = vst [vmem:[#allocation3] sm:$0xff] %v145_v7  ;;  %148 = vst [vmem:[#allocation3 + $0x8] sm:$0xff] %v147_v8  ;;  %v149_v9 = vld [vmem:[%s6077_s4 + $0x10] sm:$0xff]  ;;  %v151_v10 = vld [vmem:[%s6077_s4 + $0x18] sm:$0xff] }
  0x1f   :  { %v153_v11 = vld [vmem:[%s6077_s4 + $0x20] sm:$0xff]  ;;  %150 = vst [vmem:[#allocation3 + $0x10] sm:$0xff] %v149_v9  ;;  %152 = vst [vmem:[#allocation3 + $0x18] sm:$0xff] %v151_v10  ;;  %v155_v12 = vld [vmem:[%s6077_s4 + $0x28] sm:$0xff] }
  0x20   :  { %154 = vst [vmem:[#allocation3 + $0x20] sm:$0xff] %v153_v11  ;;  %v157_v13 = vld [vmem:[%s6077_s4 + $0x30] sm:$0xff]  ;;  %v159_v14 = vld [vmem:[%s6077_s4 + $0x38] sm:$0xff]  ;;  %156 = vst [vmem:[#allocation3 + $0x28] sm:$0xff] %v155_v12 }
  0x21   :  { %158 = vst [vmem:[#allocation3 + $0x30] sm:$0xff] %v157_v13  ;;  %160 = vst [vmem:[#allocation3 + $0x38] sm:$0xff] %v159_v14  ;;  %v161_v15 = vld [vmem:[%s6077_s4 + $0x40] sm:$0xff]  ;;  %v163_v16 = vld [vmem:[%s6077_s4 + $0x48] sm:$0xff] }
  0x22   :  { %v165_v17 = vld [vmem:[%s6077_s4 + $0x50] sm:$0xff]  ;;  %162 = vst [vmem:[#allocation3 + $0x40] sm:$0xff] %v161_v15  ;;  %164 = vst [vmem:[#allocation3 + $0x48] sm:$0xff] %v163_v16  ;;  %v167_v18 = vld [vmem:[%s6077_s4 + $0x58] sm:$0xff] }
  0x23   :  { %166 = vst [vmem:[#allocation3 + $0x50] sm:$0xff] %v165_v17  ;;  %v169_v19 = vld [vmem:[%s6077_s4 + $0x60] sm:$0xff]  ;;  %v171_v20 = vld [vmem:[%s6077_s4 + $0x68] sm:$0xff]  ;;  %168 = vst [vmem:[#allocation3 + $0x58] sm:$0xff] %v167_v18 }
  0x24   :  { %170 = vst [vmem:[#allocation3 + $0x60] sm:$0xff] %v169_v19  ;;  %172 = vst [vmem:[#allocation3 + $0x68] sm:$0xff] %v171_v20  ;;  %v173_v21 = vld [vmem:[%s6077_s4 + $0x70] sm:$0xff]  ;;  %v175_v22 = vld [vmem:[%s6077_s4 + $0x78] sm:$0xff] }
  0x25   :  { %v177_v23 = vld [vmem:[%s6077_s4 + $0x80] sm:$0xff]  ;;  %174 = vst [vmem:[#allocation3 + $0x70] sm:$0xff] %v173_v21  ;;  %176 = vst [vmem:[#allocation3 + $0x78] sm:$0xff] %v175_v22  ;;  %v179_v24 = vld [vmem:[%s6077_s4 + $0x88] sm:$0xff] }
  0x26   :  { %178 = vst [vmem:[#allocation3 + $0x80] sm:$0xff] %v177_v23  ;;  %v181_v25 = vld [vmem:[%s6077_s4 + $0x90] sm:$0xff]  ;;  %v183_v26 = vld [vmem:[%s6077_s4 + $0x98] sm:$0xff]  ;;  %180 = vst [vmem:[#allocation3 + $0x88] sm:$0xff] %v179_v24 }
  0x27   :  { %182 = vst [vmem:[#allocation3 + $0x90] sm:$0xff] %v181_v25  ;;  %184 = vst [vmem:[#allocation3 + $0x98] sm:$0xff] %v183_v26  ;;  %v185_v27 = vld [vmem:[%s6077_s4 + $0xa0] sm:$0xff]  ;;  %v187_v28 = vld [vmem:[%s6077_s4 + $0xa8] sm:$0xff] }
  0x28   :  { %v189_v29 = vld [vmem:[%s6077_s4 + $0xb0] sm:$0xff]  ;;  %186 = vst [vmem:[#allocation3 + $0xa0] sm:$0xff] %v185_v27  ;;  %188 = vst [vmem:[#allocation3 + $0xa8] sm:$0xff] %v187_v28  ;;  %v191_v30 = vld [vmem:[%s6077_s4 + $0xb8] sm:$0xff] }
  0x29   :  { %190 = vst [vmem:[#allocation3 + $0xb0] sm:$0xff] %v189_v29  ;;  %v193_v31 = vld [vmem:[%s6077_s4 + $0xc0] sm:$0xff]  ;;  %v195_v32 = vld [vmem:[%s6077_s4 + $0xc8] sm:$0xff]  ;;  %192 = vst [vmem:[#allocation3 + $0xb8] sm:$0xff] %v191_v30 }
  0x2a   :  { %194 = vst [vmem:[#allocation3 + $0xc0] sm:$0xff] %v193_v31  ;;  %196 = vst [vmem:[#allocation3 + $0xc8] sm:$0xff] %v195_v32  ;;  %v197_v33 = vld [vmem:[%s6077_s4 + $0xd0] sm:$0xff]  ;;  %v199_v34 = vld [vmem:[%s6077_s4 + $0xd8] sm:$0xff] }
  0x2b   :  { %v201_v35 = vld [vmem:[%s6077_s4 + $0xe0] sm:$0xff]  ;;  %198 = vst [vmem:[#allocation3 + $0xd0] sm:$0xff] %v197_v33  ;;  %200 = vst [vmem:[#allocation3 + $0xd8] sm:$0xff] %v199_v34  ;;  %v203_v36 = vld [vmem:[%s6077_s4 + $0xe8] sm:$0xff] }
  0x2c   :  { %202 = vst [vmem:[#allocation3 + $0xe0] sm:$0xff] %v201_v35  ;;  %v205_v37 = vld [vmem:[%s6077_s4 + $0xf0] sm:$0xff]  ;;  %v207_v38 = vld [vmem:[%s6077_s4 + $0xf8] sm:$0xff]  ;;  %204 = vst [vmem:[#allocation3 + $0xe8] sm:$0xff] %v203_v36 }
  0x2d   :  { %206 = vst [vmem:[#allocation3 + $0xf0] sm:$0xff] %v205_v37  ;;  %208 = vst [vmem:[#allocation3 + $0xf8] sm:$0xff] %v207_v38  ;;  %v209_v39 = vld [vmem:[%s6077_s4 + $0x100] sm:$0xff]  ;;  %v211_v40 = vld [vmem:[%s6077_s4 + $0x108] sm:$0xff] }
  0x2e   :  { %v213_v41 = vld [vmem:[%s6077_s4 + $0x110] sm:$0xff]  ;;  %210 = vst [vmem:[#allocation3 + $0x100] sm:$0xff] %v209_v39  ;;  %212 = vst [vmem:[#allocation3 + $0x108] sm:$0xff] %v211_v40  ;;  %v215_v42 = vld [vmem:[%s6077_s4 + $0x118] sm:$0xff] }
  0x2f   :  { %214 = vst [vmem:[#allocation3 + $0x110] sm:$0xff] %v213_v41  ;;  %v217_v43 = vld [vmem:[%s6077_s4 + $0x120] sm:$0xff]  ;;  %v219_v44 = vld [vmem:[%s6077_s4 + $0x128] sm:$0xff]  ;;  %216 = vst [vmem:[#allocation3 + $0x118] sm:$0xff] %v215_v42 }
  0x30   :  { %218 = vst [vmem:[#allocation3 + $0x120] sm:$0xff] %v217_v43  ;;  %220 = vst [vmem:[#allocation3 + $0x128] sm:$0xff] %v219_v44  ;;  %v221_v45 = vld [vmem:[%s6077_s4 + $0x130] sm:$0xff]  ;;  %v223_v46 = vld [vmem:[%s6077_s4 + $0x138] sm:$0xff] }
  0x31   :  { %v225_v47 = vld [vmem:[%s6077_s4 + $0x140] sm:$0xff]  ;;  %222 = vst [vmem:[#allocation3 + $0x130] sm:$0xff] %v221_v45  ;;  %224 = vst [vmem:[#allocation3 + $0x138] sm:$0xff] %v223_v46  ;;  %v227_v48 = vld [vmem:[%s6077_s4 + $0x148] sm:$0xff] }
  0x32   :  { %226 = vst [vmem:[#allocation3 + $0x140] sm:$0xff] %v225_v47  ;;  %v229_v49 = vld [vmem:[%s6077_s4 + $0x150] sm:$0xff]  ;;  %v231_v50 = vld [vmem:[%s6077_s4 + $0x158] sm:$0xff]  ;;  %228 = vst [vmem:[#allocation3 + $0x148] sm:$0xff] %v227_v48 }
  0x33   :  { %230 = vst [vmem:[#allocation3 + $0x150] sm:$0xff] %v229_v49  ;;  %232 = vst [vmem:[#allocation3 + $0x158] sm:$0xff] %v231_v50  ;;  %v233_v51 = vld [vmem:[%s6077_s4 + $0x160] sm:$0xff]  ;;  %v235_v52 = vld [vmem:[%s6077_s4 + $0x168] sm:$0xff] }
  0x34   :  { %v237_v53 = vld [vmem:[%s6077_s4 + $0x170] sm:$0xff]  ;;  %234 = vst [vmem:[#allocation3 + $0x160] sm:$0xff] %v233_v51  ;;  %236 = vst [vmem:[#allocation3 + $0x168] sm:$0xff] %v235_v52  ;;  %v239_v54 = vld [vmem:[%s6077_s4 + $0x178] sm:$0xff] }
  0x35   :  { %238 = vst [vmem:[#allocation3 + $0x170] sm:$0xff] %v237_v53  ;;  %240 = vst [vmem:[#allocation3 + $0x178] sm:$0xff] %v239_v54 }
  0x36   :  { %248 = vsyncadd [#allocation6 + $0x2], 6144  ;;  %v283_v55 = vld [vmem:[%s6078_s5] sm:$0xff]  ;;  %v285_v56 = vld [vmem:[%s6078_s5 + $0x8] sm:$0xff] }
  0x37   :  { %284 = vst [vmem:[#allocation4] sm:$0xff] %v283_v55  ;;  %286 = vst [vmem:[#allocation4 + $0x8] sm:$0xff] %v285_v56  ;;  %v287_v57 = vld [vmem:[%s6078_s5 + $0x10] sm:$0xff]  ;;  %v289_v58 = vld [vmem:[%s6078_s5 + $0x18] sm:$0xff] }
  0x38   :  { %v291_v59 = vld [vmem:[%s6078_s5 + $0x20] sm:$0xff]  ;;  %288 = vst [vmem:[#allocation4 + $0x10] sm:$0xff] %v287_v57  ;;  %290 = vst [vmem:[#allocation4 + $0x18] sm:$0xff] %v289_v58  ;;  %v293_v60 = vld [vmem:[%s6078_s5 + $0x28] sm:$0xff] }
  0x39   :  { %292 = vst [vmem:[#allocation4 + $0x20] sm:$0xff] %v291_v59  ;;  %294 = vst [vmem:[#allocation4 + $0x28] sm:$0xff] %v293_v60 }
  0x3a   :  { %302 = vsyncadd [#allocation6 + $0x3], 768  ;;  %v4978_v61 = vld [vmem:[#allocation7 + $0x234] ss:$40 sps:$4 sm:$0xff]   ;;  %v4980_v62 = vld [vmem:[#allocation7 + $0x230] ss:$40 sps:$4 sm:$0xff]  }
  0x3b   :  { %v4981_v63 = vld [vmem:[#allocation7 + $0x1e4] ss:$40 sps:$4 sm:$0xff]   ;;  %1277 = vmatprep.subr.bf16.mxu0 %v4978_v61  ;;  %v4985_v1 = vld [vmem:[#allocation7 + $0x1e0] ss:$40 sps:$4 sm:$0xff]   ;;  %v4987_v3 = vld [vmem:[#allocation7 + $0x194] ss:$40 sps:$4 sm:$0xff]  }
  0x3c   :  { %v4983_v0 = vld [vmem:[#allocation7 + $0x23c] ss:$40 sps:$4 sm:$0xff]   ;;  %1278 = vmatpush1.bf16.msra.mxu0 %v4980_v62  ;;  %v4986_v2 = vld [vmem:[#allocation7 + $0x238] ss:$40 sps:$4 sm:$0xff]   ;;  %v4989_v4 = vld [vmem:[#allocation7 + $0x1ec] ss:$40 sps:$4 sm:$0xff]  }
  0x3d   :  { %1279 = vmatprep.subr.bf16.mxu0 %v4981_v63  ;;  %1318 = vmatprep.subr.bf16.mxu1 %v4983_v0  ;;  %v4992_v5 = vld [vmem:[#allocation7 + $0x1e8] ss:$40 sps:$4 sm:$0xff]   ;;  %v4995_v7 = vld [vmem:[#allocation7 + $0x19c] ss:$40 sps:$4 sm:$0xff]   ;;  %v4998_v9 = vld [vmem:[#allocation7 + $0x198] ss:$40 sps:$4 sm:$0xff]  }
  0x3e   :  { %1319 = vmatpush1.bf16.msra.mxu1 %v4986_v2  ;;  %v4991_v6 = vld [vmem:[#allocation7 + $0x190] ss:$40 sps:$4 sm:$0xff]   ;;  %v4993_v8 = vld [vmem:[#allocation7 + $0x144] ss:$40 sps:$4 sm:$0xff]   ;;  %v4997_v11 = vld [vmem:[#allocation7 + $0x140] ss:$40 sps:$4 sm:$0xff]  }
  0x3f   :  { %1320 = vmatprep.subr.bf16.mxu1 %v4989_v4  ;;  %v5001_v10 = vld [vmem:[#allocation7 + $0x14c] ss:$40 sps:$4 sm:$0xff]   ;;  %v5004_v13 = vld [vmem:[#allocation7 + $0x148] ss:$40 sps:$4 sm:$0xff]   ;;  %v5007_v14 = vld [vmem:[#allocation7 + $0xfc] ss:$40 sps:$4 sm:$0xff]  }
  0x40   :  { %1280 = vmatpush1.bf16.msra.mxu0 %v4985_v1  ;;  %v4999_v12 = vld [vmem:[#allocation7 + $0xf4] ss:$40 sps:$4 sm:$0xff]   ;;  %v5003_v15 = vld [vmem:[#allocation7 + $0xf0] ss:$40 sps:$4 sm:$0xff]   ;;  %v5005_v16 = vld [vmem:[#allocation7 + $0xa4] ss:$40 sps:$4 sm:$0xff]  }
  0x41   :  { %1281 = vmatprep.subr.bf16.mxu0 %v4987_v3  ;;  %v5010_v17 = vld [vmem:[#allocation7 + $0xf8] ss:$40 sps:$4 sm:$0xff]   ;;  %v5013_v18 = vld [vmem:[#allocation7 + $0xac] ss:$40 sps:$4 sm:$0xff]   ;;  %v5016_v21 = vld [vmem:[#allocation7 + $0xa8] ss:$40 sps:$4 sm:$0xff]  }
  0x42   :  { %1321 = vmatpush1.bf16.msra.mxu1 %v4992_v5  ;;  %v5009_v19 = vld [vmem:[#allocation7 + $0xa0] ss:$40 sps:$4 sm:$0xff]   ;;  %v5011_v20 = vld [vmem:[#allocation7 + $0x54] ss:$40 sps:$4 sm:$0xff]   ;;  %v5015_v23 = vld [vmem:[#allocation7 + $0x50] ss:$40 sps:$4 sm:$0xff]  }
  0x43   :  { %1322 = vmatprep.subr.bf16.mxu1 %v4995_v7  ;;  %v5019_v22 = vld [vmem:[#allocation7 + $0x5c] ss:$40 sps:$4 sm:$0xff]   ;;  %v5022_v25 = vld [vmem:[#allocation7 + $0x58] ss:$40 sps:$4 sm:$0xff]   ;;  %v5025_v26 = vld [vmem:[#allocation7 + $0xc] ss:$40 sps:$4 sm:$0xff]  }
  0x44   :  { %1282 = vmatpush1.bf16.msra.mxu0 %v4991_v6  ;;  %v5017_v24 = vld [vmem:[#allocation7 + $0x4] ss:$40 sps:$4 sm:$0xff]   ;;  %v5021_v27 = vld [vmem:[#allocation7] ss:$40 sps:$4 sm:$0xff]   ;;  %v5023_v28 = vld [vmem:[#allocation7 + $0x4b4] ss:$40 sps:$4 sm:$0xff]  }
  0x45   :  { %1283 = vmatprep.subr.bf16.mxu0 %v4993_v8  ;;  %v5028_v29 = vld [vmem:[#allocation7 + $0x8] ss:$40 sps:$4 sm:$0xff]   ;;  %v5031_v30 = vld [vmem:[#allocation7 + $0x4bc] ss:$40 sps:$4 sm:$0xff]   ;;  %v5034_v33 = vld [vmem:[#allocation7 + $0x4b8] ss:$40 sps:$4 sm:$0xff]  }
  0x46   :  { %1323 = vmatpush1.bf16.msra.mxu1 %v4998_v9  ;;  %v5027_v31 = vld [vmem:[#allocation7 + $0x4b0] ss:$40 sps:$4 sm:$0xff]   ;;  %v5029_v32 = vld [vmem:[#allocation7 + $0x464] ss:$40 sps:$4 sm:$0xff]   ;;  %v5033_v35 = vld [vmem:[#allocation7 + $0x460] ss:$40 sps:$4 sm:$0xff]  }
  0x47   :  { %1324 = vmatprep.subr.bf16.mxu1 %v5001_v10  ;;  %v5037_v34 = vld [vmem:[#allocation7 + $0x46c] ss:$40 sps:$4 sm:$0xff]   ;;  %v5040_v37 = vld [vmem:[#allocation7 + $0x468] ss:$40 sps:$4 sm:$0xff]   ;;  %v5043_v38 = vld [vmem:[#allocation7 + $0x41c] ss:$40 sps:$4 sm:$0xff]  }
  0x48   :  { %1284 = vmatpush1.bf16.msra.mxu0 %v4997_v11  ;;  %v5035_v36 = vld [vmem:[#allocation7 + $0x414] ss:$40 sps:$4 sm:$0xff]   ;;  %v5039_v39 = vld [vmem:[#allocation7 + $0x410] ss:$40 sps:$4 sm:$0xff]   ;;  %v5041_v40 = vld [vmem:[#allocation7 + $0x3c4] ss:$40 sps:$4 sm:$0xff]  }
  0x49   :  { %1285 = vmatprep.subr.bf16.mxu0 %v4999_v12  ;;  %v5046_v41 = vld [vmem:[#allocation7 + $0x418] ss:$40 sps:$4 sm:$0xff]   ;;  %v4545_v42 = vld.sshfl [vmem:[%s6073_s0] sm:$0x33 pattern:$0x76325410] }
  0x4a   :  { %1325 = vmatpush1.bf16.msra.mxu1 %v5004_v13  ;;  %v5049_v43 = vld [vmem:[#allocation7 + $0x3cc] ss:$40 sps:$4 sm:$0xff]   ;;  %v472_v44 = vcombine.high %v4545_v42, %v4545_v42  ;;  %v5045_v45 = vld [vmem:[#allocation7 + $0x3c0] ss:$40 sps:$4 sm:$0xff]   ;;  %v5055_v49 = vld [vmem:[#allocation7 + $0x37c] ss:$40 sps:$4 sm:$0xff]   ;;  %v5739_v1 = vpack.c.bf16 %v4545_v42, %v4545_v42 }
  0x4b   :  { %1326 = vmatprep.subr.bf16.mxu1 %v5007_v14  ;;  %v5047_v46 = vld [vmem:[#allocation7 + $0x374] ss:$40 sps:$4 sm:$0xff]   ;;  %v5052_v48 = vld [vmem:[#allocation7 + $0x3c8] ss:$40 sps:$4 sm:$0xff]   ;;  %v5053_v51 = vld [vmem:[#allocation7 + $0x324] ss:$40 sps:$4 sm:$0xff]  }
  0x4c   :  { %1286 = vmatpush1.bf16.msra.mxu0 %v5003_v15  ;;  %v5735_v47 = vpack.c.bf16 %v472_v44, %v472_v44  ;;  %v5051_v50 = vld [vmem:[#allocation7 + $0x370] ss:$40 sps:$4 sm:$0xff]   ;;  %v5061_v53 = vld [vmem:[#allocation7 + $0x32c] ss:$40 sps:$4 sm:$0xff]   ;;  %v5057_v54 = vld [vmem:[#allocation7 + $0x320] ss:$40 sps:$4 sm:$0xff]  }
  0x4d   :  { %1287 = vmatprep.subr.bf16.mxu0 %v5005_v16  ;;  %v5058_v52 = vld [vmem:[#allocation7 + $0x378] ss:$40 sps:$4 sm:$0xff]   ;;  %v5059_v55 = vld [vmem:[#allocation7 + $0x2d4] ss:$40 sps:$4 sm:$0xff]   ;;  %v5064_v56 = vld [vmem:[#allocation7 + $0x328] ss:$40 sps:$4 sm:$0xff]  }
  0x4e   :  { %1327 = vmatpush1.bf16.msra.mxu1 %v5010_v17  ;;  %1309 = vmatprep.mubr.bf16.mxu0 %v5735_v47  ;;  %v5067_v57 = vld [vmem:[#allocation7 + $0x2dc] ss:$40 sps:$4 sm:$0xff]   ;;  %v5063_v58 = vld [vmem:[#allocation7 + $0x2d0] ss:$40 sps:$4 sm:$0xff]   ;;  %v5071_v61 = vld [vmem:[#allocation7 + $0x28c] ss:$40 sps:$4 sm:$0xff]  }
  0x4f   :  { %1328 = vmatprep.subr.bf16.mxu1 %v5013_v18  ;;  %1350 = vmatprep.mubr.bf16.mxu1 %v5735_v47  ;;  %v5065_v59 = vld [vmem:[#allocation7 + $0x284] ss:$40 sps:$4 sm:$0xff]   ;;  %v5070_v60 = vld [vmem:[#allocation7 + $0x2d8] ss:$40 sps:$4 sm:$0xff]   ;;  %v5076_v0 = vld [vmem:[#allocation7 + $0x288] ss:$40 sps:$4 sm:$0xff]  }
  0x50   :  { %1288 = vmatpush1.bf16.msra.mxu0 %v5009_v19  ;;  %v5069_v62 = vld [vmem:[#allocation7 + $0x280] ss:$40 sps:$4 sm:$0xff]   ;;  %v5075_v63 = vld [vmem:[#allocation7 + $0x244] ss:$40 sps:$4 sm:$0xff]   ;;  %v5079_v4 = vld [vmem:[#allocation7 + $0x1f4] ss:$40 sps:$4 sm:$0xff]  }
  0x51   :  { %1289 = vmatprep.subr.bf16.mxu0 %v5011_v20  ;;  %v5082_v2 = vld [vmem:[#allocation7 + $0x24c] ss:$40 sps:$4 sm:$0xff]   ;;  %v5073_v3 = vld [vmem:[#allocation7 + $0x240] ss:$40 sps:$4 sm:$0xff]   ;;  %v5088_v6 = vld [vmem:[#allocation7 + $0x1fc] ss:$40 sps:$4 sm:$0xff]  }
  0x52   :  { %1329 = vmatpush1.bf16.msra.mxu1 %v5016_v21  ;;  %v5080_v5 = vld [vmem:[#allocation7 + $0x248] ss:$40 sps:$4 sm:$0xff]   ;;  %v5085_v8 = vld [vmem:[#allocation7 + $0x1a4] ss:$40 sps:$4 sm:$0xff]   ;;  %v5086_v9 = vld [vmem:[#allocation7 + $0x1f8] ss:$40 sps:$4 sm:$0xff]  }
  0x53   :  { %1330 = vmatprep.subr.bf16.mxu1 %v5019_v22  ;;  %v5077_v7 = vld [vmem:[#allocation7 + $0x1f0] ss:$40 sps:$4 sm:$0xff]   ;;  %v5094_v10 = vld [vmem:[#allocation7 + $0x1ac] ss:$40 sps:$4 sm:$0xff]   ;;  %v5083_v11 = vld [vmem:[#allocation7 + $0x1a0] ss:$40 sps:$4 sm:$0xff]  }
  0x54   :  { %1290 = vmatpush1.bf16.msra.mxu0 %v5015_v23  ;;  %v5091_v12 = vld [vmem:[#allocation7 + $0x154] ss:$40 sps:$4 sm:$0xff]   ;;  %v5092_v13 = vld [vmem:[#allocation7 + $0x1a8] ss:$40 sps:$4 sm:$0xff]   ;;  %v5097_v16 = vld [vmem:[#allocation7 + $0x104] ss:$40 sps:$4 sm:$0xff]  }
  0x55   :  { %1291 = vmatprep.subr.bf16.mxu0 %v5017_v24  ;;  %v5100_v14 = vld [vmem:[#allocation7 + $0x15c] ss:$40 sps:$4 sm:$0xff]   ;;  %v5089_v15 = vld [vmem:[#allocation7 + $0x150] ss:$40 sps:$4 sm:$0xff]   ;;  %v5106_v18 = vld [vmem:[#allocation7 + $0x10c] ss:$40 sps:$4 sm:$0xff]  }
  0x56   :  { %1331 = vmatpush1.bf16.msra.mxu1 %v5022_v25  ;;  %v5098_v17 = vld [vmem:[#allocation7 + $0x158] ss:$40 sps:$4 sm:$0xff]   ;;  %v5103_v20 = vld [vmem:[#allocation7 + $0xb4] ss:$40 sps:$4 sm:$0xff]   ;;  %v5104_v21 = vld [vmem:[#allocation7 + $0x108] ss:$40 sps:$4 sm:$0xff]  }
  0x57   :  { %1332 = vmatprep.subr.bf16.mxu1 %v5025_v26  ;;  %v5095_v19 = vld [vmem:[#allocation7 + $0x100] ss:$40 sps:$4 sm:$0xff]   ;;  %v5112_v22 = vld [vmem:[#allocation7 + $0xbc] ss:$40 sps:$4 sm:$0xff]   ;;  %v5101_v23 = vld [vmem:[#allocation7 + $0xb0] ss:$40 sps:$4 sm:$0xff]  }
  0x58   :  { %1292 = vmatpush1.bf16.msra.mxu0 %v5021_v27  ;;  %v5109_v24 = vld [vmem:[#allocation7 + $0x64] ss:$40 sps:$4 sm:$0xff]   ;;  %v5110_v25 = vld [vmem:[#allocation7 + $0xb8] ss:$40 sps:$4 sm:$0xff]   ;;  %v5139_v44 = vld [vmem:[#allocation7 + $0x3d4] ss:$40 sps:$4 sm:$0xff]  }
  0x59   :  { %1293 = vmatprep.subr.bf16.mxu0 %v5023_v28  ;;  %v5118_v26 = vld [vmem:[#allocation7 + $0x6c] ss:$40 sps:$4 sm:$0xff]   ;;  %v5107_v27 = vld [vmem:[#allocation7 + $0x60] ss:$40 sps:$4 sm:$0xff]   ;;  %vm1494_vm0 = vcmask 1041408   ;;  %vm1645_vm1 = vcmask 1040384  }
  0x5a   :  { %1333 = vmatpush1.bf16.msra.mxu1 %v5028_v29  ;;  %v5115_v28 = vld [vmem:[#allocation7 + $0x14] ss:$40 sps:$4 sm:$0xff]   ;;  %v5116_v29 = vld [vmem:[#allocation7 + $0x68] ss:$40 sps:$4 sm:$0xff]   ;;  %vm2029_vm2 = vcmask 1043456   ;;  %vm2025_vm3 = vcmask 31744  }
  0x5b   :  { %1334 = vmatprep.subr.bf16.mxu1 %v5031_v30  ;;  %v5124_v30 = vld [vmem:[#allocation7 + $0x1c] ss:$40 sps:$4 sm:$0xff]   ;;  %v5142_v42 = vld [vmem:[#allocation7 + $0x42c] ss:$40 sps:$4 sm:$0xff]  }
  0x5c   :  { %1294 = vmatpush2.bf16.msra.mxu0 %v5027_v31  ;;  %v5113_v31 = vld [vmem:[#allocation7 + $0x10] ss:$40 sps:$4 sm:$0xff]  }
  0x5d   :  { %1295 = vmatprep.subr.bf16.mxu0 %v5029_v32  ;;  %v5121_v32 = vld [vmem:[#allocation7 + $0x4c4] ss:$40 sps:$4 sm:$0xff]  }
  0x5e   :  { %1335 = vmatpush2.bf16.msra.mxu1 %v5034_v33  ;;  %v5122_v33 = vld [vmem:[#allocation7 + $0x18] ss:$40 sps:$4 sm:$0xff]  }
  0x5f   :  { %1336 = vmatprep.subr.bf16.mxu1 %v5037_v34  ;;  %v5130_v34 = vld [vmem:[#allocation7 + $0x4cc] ss:$40 sps:$4 sm:$0xff]  }
  0x60   :  { %1296 = vmatpush2.bf16.msra.mxu0 %v5033_v35  ;;  %v5119_v35 = vld [vmem:[#allocation7 + $0x4c0] ss:$40 sps:$4 sm:$0xff]  }
  0x61   :  { %1297 = vmatprep.subr.bf16.mxu0 %v5035_v36  ;;  %v5127_v36 = vld [vmem:[#allocation7 + $0x474] ss:$40 sps:$4 sm:$0xff]  }
  0x62   :  { %1337 = vmatpush2.bf16.msra.mxu1 %v5040_v37  ;;  %v5128_v37 = vld [vmem:[#allocation7 + $0x4c8] ss:$40 sps:$4 sm:$0xff]  }
  0x63   :  { %1338 = vmatprep.subr.bf16.mxu1 %v5043_v38  ;;  %v5136_v38 = vld [vmem:[#allocation7 + $0x47c] ss:$40 sps:$4 sm:$0xff]  }
  0x64   :  { %1298 = vmatpush2.bf16.msra.mxu0 %v5039_v39  ;;  %v5125_v39 = vld [vmem:[#allocation7 + $0x470] ss:$40 sps:$4 sm:$0xff]  }
  0x65   :  { %1299 = vmatprep.subr.bf16.mxu0 %v5041_v40  ;;  %v5133_v40 = vld [vmem:[#allocation7 + $0x424] ss:$40 sps:$4 sm:$0xff]  }
  0x66   :  { %1339 = vmatpush2.bf16.msra.mxu1 %v5046_v41  ;;  %v5134_v41 = vld [vmem:[#allocation7 + $0x478] ss:$40 sps:$4 sm:$0xff]  }
  0x67   :  { %1340 = vmatprep.subr.bf16.mxu1 %v5049_v43  ;;  %v5131_v43 = vld [vmem:[#allocation7 + $0x420] ss:$40 sps:$4 sm:$0xff]  }
  0x68   :  { %1300 = vmatpush2.bf16.msra.mxu0 %v5045_v45  ;;  %v5140_v45 = vld [vmem:[#allocation7 + $0x428] ss:$40 sps:$4 sm:$0xff]  }
  0x69   :  { %1301 = vmatprep.subr.bf16.mxu0 %v5047_v46  ;;  %v5148_v46 = vld [vmem:[#allocation7 + $0x3dc] ss:$40 sps:$4 sm:$0xff]  }
  0x6a   :  { %1341 = vmatpush2.bf16.msra.mxu1 %v5052_v48  ;;  %v5137_v48 = vld [vmem:[#allocation7 + $0x3d0] ss:$40 sps:$4 sm:$0xff]  }
  0x6b   :  { %1342 = vmatprep.subr.bf16.mxu1 %v5055_v49  ;;  %v5145_v49 = vld [vmem:[#allocation7 + $0x384] ss:$40 sps:$4 sm:$0xff]  }
  0x6c   :  { %1302 = vmatpush2.bf16.msra.mxu0 %v5051_v50  ;;  %v5146_v50 = vld [vmem:[#allocation7 + $0x3d8] ss:$40 sps:$4 sm:$0xff]  }
  0x6d   :  { %1303 = vmatprep.subr.bf16.mxu0 %v5053_v51  ;;  %v5154_v51 = vld [vmem:[#allocation7 + $0x38c] ss:$40 sps:$4 sm:$0xff]  }
  0x6e   :  { %1343 = vmatpush2.bf16.msra.mxu1 %v5058_v52  ;;  %v5143_v52 = vld [vmem:[#allocation7 + $0x380] ss:$40 sps:$4 sm:$0xff]  }
  0x6f   :  { %1344 = vmatprep.subr.bf16.mxu1 %v5061_v53  ;;  %v5151_v53 = vld [vmem:[#allocation7 + $0x334] ss:$40 sps:$4 sm:$0xff]  }
  0x70   :  { %1304 = vmatpush2.bf16.msra.mxu0 %v5057_v54  ;;  %v5152_v54 = vld [vmem:[#allocation7 + $0x388] ss:$40 sps:$4 sm:$0xff]  }
  0x71   :  { %1305 = vmatprep.subr.bf16.mxu0 %v5059_v55  ;;  %v5160_v55 = vld [vmem:[#allocation7 + $0x33c] ss:$40 sps:$4 sm:$0xff]  }
  0x72   :  { %1345 = vmatpush2.bf16.msra.mxu1 %v5064_v56  ;;  %v5149_v56 = vld [vmem:[#allocation7 + $0x330] ss:$40 sps:$4 sm:$0xff]  }
  0x73   :  { %1346 = vmatprep.subr.bf16.mxu1 %v5067_v57  ;;  %v5157_v57 = vld [vmem:[#allocation7 + $0x2e4] ss:$40 sps:$4 sm:$0xff]  }
  0x74   :  { %1306 = vmatpush2.bf16.msra.mxu0 %v5063_v58  ;;  %v5158_v58 = vld [vmem:[#allocation7 + $0x338] ss:$40 sps:$4 sm:$0xff]  }
  0x75   :  { %1307 = vmatprep.subr.bf16.mxu0 %v5065_v59  ;;  %v5166_v59 = vld [vmem:[#allocation7 + $0x2ec] ss:$40 sps:$4 sm:$0xff]  }
  0x76   :  { %1347 = vmatpush2.bf16.msra.mxu1 %v5070_v60  ;;  %v5155_v60 = vld [vmem:[#allocation7 + $0x2e0] ss:$40 sps:$4 sm:$0xff]  }
  0x77   :  { %1348 = vmatprep.subr.bf16.mxu1 %v5071_v61  ;;  %v5163_v61 = vld [vmem:[#allocation7 + $0x294] ss:$40 sps:$4 sm:$0xff]  }
  0x78   :  { %1308 = vmatpush2.bf16.msra.mxu0 %v5069_v62  ;;  %v5164_v62 = vld [vmem:[#allocation7 + $0x2e8] ss:$40 sps:$4 sm:$0xff]  }
  0x79   :  { %1359 = vmatprep.subr.bf16.mxu0 %v5075_v63  ;;  %v5169_v63 = vld [vmem:[#allocation7 + $0x29c] ss:$40 sps:$4 sm:$0xff]  }
  0x7a   :  { %1349 = vmatpush2.bf16.msra.mxu1 %v5076_v0  ;;  %v5161_v0 = vld [vmem:[#allocation7 + $0x290] ss:$40 sps:$4 sm:$0xff]  }
  0x7b   :  { %1310 = vmatmul.mubr.bf16.vlgmr.msra.gmra.mxu0 %v5739_v1  ;;  %1400 = vmatprep.subr.bf16.mxu1 %v5082_v2  ;;  %v5172_v2 = vld [vmem:[#allocation7 + $0x254] ss:$40 sps:$4 sm:$0xff]  }
  0x7c   :  { %1360 = vmatpush1.bf16.msra.mxu0 %v5073_v3  ;;  %1391 = vmatprep.mubr.bf16.mxu0 %v5735_v47  ;;  %v5167_v3 = vld [vmem:[#allocation7 + $0x298] ss:$40 sps:$4 sm:$0xff]  }
  0x7d   :  { %1351 = vmatmul.mubr.bf16.vlgmr.msra.gmra.mxu1 %v5739_v1  ;;  %1361 = vmatprep.subr.bf16.mxu0 %v5079_v4  ;;  %v5170_v4 = vld [vmem:[#allocation7 + $0x250] ss:$40 sps:$4 sm:$0xff]  }
  0x7e   :  { %1401 = vmatpush1.bf16.msra.mxu1 %v5080_v5  ;;  %1432 = vmatprep.mubr.bf16.mxu1 %v5735_v47  ;;  %v5175_v5 = vld [vmem:[#allocation7 + $0x204] ss:$40 sps:$4 sm:$0xff]  }
  0x7f   :  { %1402 = vmatprep.subr.bf16.mxu1 %v5088_v6  ;;  %v5173_v6 = vld [vmem:[#allocation7 + $0x200] ss:$40 sps:$4 sm:$0xff]  }
  0x80   :  { %1362 = vmatpush1.bf16.msra.mxu0 %v5077_v7  ;;  %v5178_v7 = vld [vmem:[#allocation7 + $0x1b4] ss:$40 sps:$4 sm:$0xff]  }
  0x81   :  { %1363 = vmatprep.subr.bf16.mxu0 %v5085_v8  ;;  %v5176_v8 = vld [vmem:[#allocation7 + $0x1b0] ss:$40 sps:$4 sm:$0xff]  }
  0x82   :  { %1403 = vmatpush1.bf16.msra.mxu1 %v5086_v9  ;;  %v5181_v9 = vld [vmem:[#allocation7 + $0x164] ss:$40 sps:$4 sm:$0xff]  }
  0x83   :  { %1404 = vmatprep.subr.bf16.mxu1 %v5094_v10  ;;  %v5179_v10 = vld [vmem:[#allocation7 + $0x160] ss:$40 sps:$4 sm:$0xff]  }
  0x84   :  { %1364 = vmatpush1.bf16.msra.mxu0 %v5083_v11  ;;  %v5184_v11 = vld [vmem:[#allocation7 + $0x114] ss:$40 sps:$4 sm:$0xff]  }
  0x85   :  { %1365 = vmatprep.subr.bf16.mxu0 %v5091_v12  ;;  %v5182_v12 = vld [vmem:[#allocation7 + $0x110] ss:$40 sps:$4 sm:$0xff]  }
  0x86   :  { %1405 = vmatpush1.bf16.msra.mxu1 %v5092_v13  ;;  %v5187_v13 = vld [vmem:[#allocation7 + $0xc4] ss:$40 sps:$4 sm:$0xff]  }
  0x87   :  { %1406 = vmatprep.subr.bf16.mxu1 %v5100_v14  ;;  %v5756_v14 = vld [vmem:[%s6075_s2] sm:$0xf] }
  0x88   :  { %1366 = vmatpush1.bf16.msra.mxu0 %v5089_v15  ;;  %v5185_v15 = vld [vmem:[#allocation7 + $0xc0] ss:$40 sps:$4 sm:$0xff]  }
  0x89   :  { %1367 = vmatprep.subr.bf16.mxu0 %v5097_v16  ;;  %v5190_v16 = vld [vmem:[#allocation7 + $0x74] ss:$40 sps:$4 sm:$0xff]  }
  0x8a   :  { %1407 = vmatpush1.bf16.msra.mxu1 %v5098_v17  ;;  %v5763_v17 = vld [vmem:[%s6075_s2 + $0x18] sm:$0xf] }
  0x8b   :  { %1408 = vmatprep.subr.bf16.mxu1 %v5106_v18  ;;  %v5188_v18 = vld [vmem:[#allocation7 + $0x70] ss:$40 sps:$4 sm:$0xff]  }
  0x8c   :  { %1368 = vmatpush1.bf16.msra.mxu0 %v5095_v19  ;;  %v5193_v19 = vld [vmem:[#allocation7 + $0x24] ss:$40 sps:$4 sm:$0xff]  }
  0x8d   :  { %1369 = vmatprep.subr.bf16.mxu0 %v5103_v20  ;;  %v5191_v20 = vld [vmem:[#allocation7 + $0x20] ss:$40 sps:$4 sm:$0xff]  }
  0x8e   :  { %1409 = vmatpush1.bf16.msra.mxu1 %v5104_v21  ;;  %v5196_v21 = vld [vmem:[#allocation7 + $0x4d4] ss:$40 sps:$4 sm:$0xff]  }
  0x8f   :  { %1410 = vmatprep.subr.bf16.mxu1 %v5112_v22  ;;  %v5194_v22 = vld [vmem:[#allocation7 + $0x4d0] ss:$40 sps:$4 sm:$0xff]  }
  0x90   :  { %1370 = vmatpush1.bf16.msra.mxu0 %v5101_v23  ;;  %v5199_v23 = vld [vmem:[#allocation7 + $0x484] ss:$40 sps:$4 sm:$0xff]  }
  0x91   :  { %1371 = vmatprep.subr.bf16.mxu0 %v5109_v24  ;;  %v5197_v24 = vld [vmem:[#allocation7 + $0x480] ss:$40 sps:$4 sm:$0xff]  }
  0x92   :  { %1411 = vmatpush1.bf16.msra.mxu1 %v5110_v25  ;;  %v5202_v25 = vld [vmem:[#allocation7 + $0x434] ss:$40 sps:$4 sm:$0xff]  }
  0x93   :  { %1412 = vmatprep.subr.bf16.mxu1 %v5118_v26  ;;  %v5200_v26 = vld [vmem:[#allocation7 + $0x430] ss:$40 sps:$4 sm:$0xff]  }
  0x94   :  { %1372 = vmatpush1.bf16.msra.mxu0 %v5107_v27  ;;  %v5205_v27 = vld [vmem:[#allocation7 + $0x3e4] ss:$40 sps:$4 sm:$0xff]  }
  0x95   :  { %1373 = vmatprep.subr.bf16.mxu0 %v5115_v28  ;;  %v5203_v28 = vld [vmem:[#allocation7 + $0x3e0] ss:$40 sps:$4 sm:$0xff]  }
  0x96   :  { %1413 = vmatpush1.bf16.msra.mxu1 %v5116_v29  ;;  %v5208_v29 = vld [vmem:[#allocation7 + $0x394] ss:$40 sps:$4 sm:$0xff]  }
  0x97   :  { %1414 = vmatprep.subr.bf16.mxu1 %v5124_v30  ;;  %v5206_v30 = vld [vmem:[#allocation7 + $0x390] ss:$40 sps:$4 sm:$0xff]  }
  0x98   :  { %1374 = vmatpush1.bf16.msra.mxu0 %v5113_v31  ;;  %v5211_v31 = vld [vmem:[#allocation7 + $0x344] ss:$40 sps:$4 sm:$0xff]  }
  0x99   :  { %1375 = vmatprep.subr.bf16.mxu0 %v5121_v32  ;;  %v5209_v32 = vld [vmem:[#allocation7 + $0x340] ss:$40 sps:$4 sm:$0xff]  }
  0x9a   :  { %1415 = vmatpush1.bf16.msra.mxu1 %v5122_v33  ;;  %v5214_v33 = vld [vmem:[#allocation7 + $0x2f4] ss:$40 sps:$4 sm:$0xff]  }
  0x9b   :  { %1416 = vmatprep.subr.bf16.mxu1 %v5130_v34  ;;  %v5212_v34 = vld [vmem:[#allocation7 + $0x2f0] ss:$40 sps:$4 sm:$0xff]  }
  0x9c   :  { %1376 = vmatpush2.bf16.msra.mxu0 %v5119_v35  ;;  %v5217_v35 = vld [vmem:[#allocation7 + $0x2a4] ss:$40 sps:$4 sm:$0xff]  }
  0x9d   :  { %1377 = vmatprep.subr.bf16.mxu0 %v5127_v36  ;;  %v5215_v36 = vld [vmem:[#allocation7 + $0x2a0] ss:$40 sps:$4 sm:$0xff]  }
  0x9e   :  { %1417 = vmatpush2.bf16.msra.mxu1 %v5128_v37 }
  0x9f   :  { %1418 = vmatprep.subr.bf16.mxu1 %v5136_v38 }
  0xa0   :  { %1378 = vmatpush2.bf16.msra.mxu0 %v5125_v39 }
  0xa1   :  { %1379 = vmatprep.subr.bf16.mxu0 %v5133_v40 }
  0xa2   :  { %1419 = vmatpush2.bf16.msra.mxu1 %v5134_v41 }
  0xa3   :  { %1420 = vmatprep.subr.bf16.mxu1 %v5142_v42 }
  0xa4   :  { %1380 = vmatpush2.bf16.msra.mxu0 %v5131_v43 }
  0xa5   :  { %1381 = vmatprep.subr.bf16.mxu0 %v5139_v44 }
  0xa6   :  { %1421 = vmatpush2.bf16.msra.mxu1 %v5140_v45 }
  0xa7   :  { %1422 = vmatprep.subr.bf16.mxu1 %v5148_v46 }
  0xa8   :  { %1382 = vmatpush2.bf16.msra.mxu0 %v5137_v48 }
  0xa9   :  { %1383 = vmatprep.subr.bf16.mxu0 %v5145_v49 }
  0xaa   :  { %1423 = vmatpush2.bf16.msra.mxu1 %v5146_v50 }
  0xab   :  { %1424 = vmatprep.subr.bf16.mxu1 %v5154_v51 }
  0xac   :  { %1384 = vmatpush2.bf16.msra.mxu0 %v5143_v52 }
  0xad   :  { %1385 = vmatprep.subr.bf16.mxu0 %v5151_v53 }
  0xae   :  { %1425 = vmatpush2.bf16.msra.mxu1 %v5152_v54 }
  0xaf   :  { %1426 = vmatprep.subr.bf16.mxu1 %v5160_v55 }
  0xb0   :  { %1386 = vmatpush2.bf16.msra.mxu0 %v5149_v56 }
  0xb1   :  { %1387 = vmatprep.subr.bf16.mxu0 %v5157_v57 }
  0xb2   :  { %1427 = vmatpush2.bf16.msra.mxu1 %v5158_v58 }
  0xb3   :  { %1428 = vmatprep.subr.bf16.mxu1 %v5166_v59 }
  0xb4   :  { %1388 = vmatpush2.bf16.msra.mxu0 %v5155_v60 }
  0xb5   :  { %1389 = vmatprep.subr.bf16.mxu0 %v5163_v61 }
  0xb6   :  { %1429 = vmatpush2.bf16.msra.mxu1 %v5164_v62 }
  0xb7   :  { %1430 = vmatprep.subr.bf16.mxu1 %v5169_v63 }
  0xb8   :  { %1390 = vmatpush2.bf16.msra.mxu0 %v5161_v0 }
  0xb9   :  { %1441 = vmatprep.subr.bf16.mxu0 %v5172_v2 }
  0xba   :  { %1431 = vmatpush2.bf16.msra.mxu1 %v5167_v3 }
  0xbb   :  { %1392 = vmatmul.mubr.bf16.vlgmr.msra.gmra.mxu0 %v5739_v1 }
  0xbc   :  { %1442 = vmatpush1.bf16.msra.mxu0 %v5170_v4  ;;  %1473 = vmatprep.mubr.bf16.mxu0 %v5735_v47  ;;  %v5751_v47 = vld [vmem:[%s6075_s2 + $0x8] sm:$0xf] }
  0xbd   :  { %1433 = vmatmul.mubr.bf16.vlgmr.msra.gmra.mxu1 %v5739_v1  ;;  %1443 = vmatprep.subr.bf16.mxu0 %v5175_v5 }
  0xbe   :  { %1686 = vmatprep.subr.mxu1 %v5751_v47 }
  0xbf   :  { %1687 = vmatpush1.xpose.msra.mxu1 %v5756_v14 }
  0xc0   :  { %1444 = vmatpush1.bf16.msra.mxu0 %v5173_v6  ;;  %1756 = vmatprep.subr.mxu1 %v5763_v17 }
  0xc1   :  { %1445 = vmatprep.subr.bf16.mxu0 %v5178_v7 }
  0xc4   :  { %1446 = vmatpush1.bf16.msra.mxu0 %v5176_v8 }
  0xc5   :  { %1447 = vmatprep.subr.bf16.mxu0 %v5181_v9 }
  0xc8   :  { %1448 = vmatpush1.bf16.msra.mxu0 %v5179_v10 }
  0xc9   :  { %1449 = vmatprep.subr.bf16.mxu0 %v5184_v11 }
  0xcc   :  { %1450 = vmatpush1.bf16.msra.mxu0 %v5182_v12 }
  0xcd   :  { %1451 = vmatprep.subr.bf16.mxu0 %v5187_v13 }
  0xd0   :  { %1452 = vmatpush1.bf16.msra.mxu0 %v5185_v15 }
  0xd1   :  { %1453 = vmatprep.subr.bf16.mxu0 %v5190_v16 }
  0xd4   :  { %1454 = vmatpush1.bf16.msra.mxu0 %v5188_v18 }
  0xd5   :  { %1455 = vmatprep.subr.bf16.mxu0 %v5193_v19 }
  0xd8   :  { %1456 = vmatpush1.bf16.msra.mxu0 %v5191_v20 }
  0xd9   :  { %1457 = vmatprep.subr.bf16.mxu0 %v5196_v21 }
  0xdc   :  { %1458 = vmatpush2.bf16.msra.mxu0 %v5194_v22 }
  0xdd   :  { %1459 = vmatprep.subr.bf16.mxu0 %v5199_v23 }
  0xe0   :  { %1460 = vmatpush2.bf16.msra.mxu0 %v5197_v24 }
  0xe1   :  { %1461 = vmatprep.subr.bf16.mxu0 %v5202_v25 }
  0xe4   :  { %1462 = vmatpush2.bf16.msra.mxu0 %v5200_v26 }
  0xe5   :  { %1463 = vmatprep.subr.bf16.mxu0 %v5205_v27 }
  0xe8   :  { %1464 = vmatpush2.bf16.msra.mxu0 %v5203_v28 }
  0xe9   :  { %1465 = vmatprep.subr.bf16.mxu0 %v5208_v29 }
  0xec   :  { %1466 = vmatpush2.bf16.msra.mxu0 %v5206_v30 }
  0xed   :  { %1467 = vmatprep.subr.bf16.mxu0 %v5211_v31 }
  0xf0   :  { %1468 = vmatpush2.bf16.msra.mxu0 %v5209_v32 }
  0xf1   :  { %1469 = vmatprep.subr.bf16.mxu0 %v5214_v33 }
  0xf4   :  { %1470 = vmatpush2.bf16.msra.mxu0 %v5212_v34 }
  0xf5   :  { %1471 = vmatprep.subr.bf16.mxu0 %v5217_v35 }
  0xf8   :  { %1472 = vmatpush2.bf16.msra.mxu0 %v5215_v36 }
  0xfb   :  { %1474 = vmatmul.mubr.bf16.vlgmr.msra.gmra.mxu0 %v5739_v1 }
 0x13b   :  { %v5767_v37 = vpop.f32.mrf.mxu0 }
 0x13c   :  { %v1495_v38 = vsel %vm1494_vm0, %v5767_v37, 0.0  ;;  %v1565_v39 = vmul.f32 %v5767_v37, %v5767_v37 }
 0x13d   :  { %v1496_v40 = vrot.slane %v1495_v38, 4  ;;  %v5773_v41 = vpop.f32.mrf.mxu0  ;;  %v5775_v42 = vpop.f32.mrf.mxu1 }
 0x13e   :  { %v1575_v43 = vsel %vm1494_vm0, %v1565_v39, 0.0  ;;  %v1502_v44 = vsel %vm1494_vm0, %v5773_v41, 0.0  ;;  %v1566_v1 = vmul.f32 %v5773_v41, %v5773_v41  ;;  %v1509_v45 = vsel %vm1494_vm0, %v5775_v42, 0.0 }
 0x13f   :  { %v1497_v46 = vadd.f32 %v1496_v40, %v1495_v38  ;;  %v1576_v48 = vrot.slane %v1575_v43, 4  ;;  %v1503_v49 = vrot.slane %v1502_v44, 4  ;;  %v1315_v50 = vpop.f32.mrf.mxu0  ;;  %v1510_v51 = vrot.slane %v1509_v45, 4  ;;  %v5784_v52 = vpop.f32.mrf.mxu1 }
 0x140   :  { %v1582_v53 = vsel %vm1494_vm0, %v1566_v1, 0.0  ;;  %v1567_v54 = vmul.f32 %v5775_v42, %v5775_v42  ;;  %v1516_v55 = vsel %vm1494_vm0, %v5784_v52, 0.0  ;;  %v1568_v56 = vmul.f32 %v5784_v52, %v5784_v52  ;;  %v5805_v50 = vld [vmem:[%s6075_s2 + $0x28] sm:$0xf] }
 0x141   :  { %v1498_v57 = vrot.slane %v1497_v46, 2  ;;  %v1577_v58 = vadd.f32 %v1576_v48, %v1575_v43  ;;  %v1504_v59 = vadd.f32 %v1503_v49, %v1502_v44  ;;  %v1583_v60 = vrot.slane %v1582_v53, 4  ;;  %v1316_v61 = vpop.f32.mrf.mxu0  ;;  %v1356_v62 = vpop.f32.mrf.mxu1 }
 0x142   :  { %v1511_v63 = vadd.f32 %v1510_v51, %v1509_v45  ;;  %v1589_v0 = vsel %vm1494_vm0, %v1567_v54, 0.0  ;;  %v1517_v2 = vrot.slane %v1516_v55, 4  ;;  %v1596_v3 = vsel %vm1494_vm0, %v1568_v56, 0.0  ;;  %v5799_v45 = vld [vmem:[%s6075_s2 + $0x10] sm:$0xf] }
 0x143   :  { %v1499_v4 = vadd.f32 %v1498_v57, %v1497_v46  ;;  %v1578_v5 = vrot.slane %v1577_v58, 2  ;;  %v1505_v6 = vrot.slane %v1504_v59, 2  ;;  %v1584_v7 = vadd.f32 %v1583_v60, %v1582_v53  ;;  %v1357_v8 = vpop.f32.mrf.mxu1  ;;  %v5814_v54 = vld [vmem:[%s6075_s2 + $0x20] sm:$0xf] }
 0x144   :  { %v1512_v9 = vrot.slane %v1511_v63, 2  ;;  %v1590_v10 = vrot.slane %v1589_v0, 4  ;;  %v1518_v11 = vadd.f32 %v1517_v2, %v1516_v55  ;;  %v1597_v12 = vrot.slane %v1596_v3, 4  ;;  %v5819_v55 = vld [vmem:[%s6075_s2 + $0x38] sm:$0xf] }
 0x145   :  { %v1579_v13 = vadd.f32 %v1578_v5, %v1577_v58  ;;  %v1506_v15 = vadd.f32 %v1505_v6, %v1504_v59  ;;  %v1585_v16 = vrot.slane %v1584_v7, 2  ;;  %v1500_v22 = vrot.slane %v1499_v4, 1 }
 0x146   :  { %v1513_v18 = vadd.f32 %v1512_v9, %v1511_v63  ;;  %v1591_v19 = vadd.f32 %v1590_v10, %v1589_v0  ;;  %v1519_v20 = vrot.slane %v1518_v11, 2  ;;  %v1598_v21 = vadd.f32 %v1597_v12, %v1596_v3 }
 0x147   :  { %v1507_v23 = vrot.slane %v1506_v15, 1  ;;  %v1586_v24 = vadd.f32 %v1585_v16, %v1584_v7  ;;  %v1580_v25 = vrot.slane %v1579_v13, 1  ;;  %v1501_v38 = vadd.f32 %v1500_v22, %v1499_v4 }
 0x148   :  { %v1514_v26 = vrot.slane %v1513_v18, 1  ;;  %v1592_v27 = vrot.slane %v1591_v19, 2  ;;  %v1520_v28 = vadd.f32 %v1519_v20, %v1518_v11  ;;  %v1599_v29 = vrot.slane %v1598_v21, 2 }
 0x149   :  { %v1587_v30 = vrot.slane %v1586_v24, 1  ;;  %v1581_v32 = vadd.f32 %v1580_v25, %v1579_v13  ;;  %v1508_v35 = vadd.f32 %v1507_v23, %v1506_v15 }
 0x14a   :  { %v1593_v31 = vadd.f32 %v1592_v27, %v1591_v19  ;;  %v1521_v33 = vrot.slane %v1520_v28, 1  ;;  %v1600_v34 = vadd.f32 %v1599_v29, %v1598_v21  ;;  %v1515_v43 = vadd.f32 %v1514_v26, %v1513_v18 }
 0x14b   :  { %v1588_v36 = vadd.f32 %v1587_v30, %v1586_v24  ;;  %v1646_v46 = vsel %vm1645_vm1, %v1501_v38, %v1581_v32 }
 0x14c   :  { %v1522_v39 = vadd.f32 %v1521_v33, %v1520_v28  ;;  %v1601_v40 = vrot.slane %v1600_v34, 1  ;;  %v1594_v44 = vrot.slane %v1593_v31, 1 }
 0x14d   :  { %v1647_v1 = vsel %vm1645_vm1, %v1508_v35, %v1588_v36 }
 0x14e   :  { %1720 = vmatprep.mubr.f32.mxu1 %v1647_v1  ;;  %v1602_v48 = vadd.f32 %v1601_v40, %v1600_v34  ;;  %v1595_v49 = vadd.f32 %v1594_v44, %v1593_v31 }
 0x14f   :  { %1721 = vmatmul.mubr.f32.vlgmr.msra.gmra.mxu1 %v1646_v46 }
 0x150   :  { %1757 = vmatpush1.xpose.msra.mxu1 %v5799_v45  ;;  %v1649_v51 = vsel %vm1645_vm1, %v1522_v39, %v1602_v48  ;;  %v1648_v53 = vsel %vm1645_vm1, %v1515_v43, %v1595_v49 }
 0x151   :  { %1790 = vmatprep.mubr.f32.mxu1 %v1649_v51  ;;  %1826 = vmatprep.subr.mxu1 %v5805_v50 }
 0x153   :  { %1791 = vmatmul.mubr.f32.vlgmr.msra.gmra.mxu1 %v1648_v53 }
 0x154   :  { %1827 = vmatpush1.xpose.msra.mxu1 %v5814_v54 }
 0x155   :  { %1896 = vmatprep.subr.mxu1 %v5819_v55 }
 0x17b   :  { %v5823_v56 = vpop.f32.mrf.mxu0 }
 0x17c   :  { %v1523_v57 = vsel %vm1494_vm0, %v5823_v56, 0.0  ;;  %v1569_v58 = vmul.f32 %v5823_v56, %v5823_v56 }
 0x17d   :  { %v1524_v59 = vrot.slane %v1523_v57, 4  ;;  %v5829_v60 = vpop.f32.mrf.mxu0  ;;  %v5831_v61 = vpop.f32.mrf.mxu1 }
 0x17e   :  { %v1603_v62 = vsel %vm1494_vm0, %v1569_v58, 0.0  ;;  %v1530_v63 = vsel %vm1494_vm0, %v5829_v60, 0.0  ;;  %v1570_v0 = vmul.f32 %v5829_v60, %v5829_v60  ;;  %v1537_v2 = vsel %vm1494_vm0, %v5831_v61, 0.0 }
 0x17f   :  { %v1525_v3 = vadd.f32 %v1524_v59, %v1523_v57  ;;  %v1604_v4 = vrot.slane %v1603_v62, 4  ;;  %v1531_v5 = vrot.slane %v1530_v63, 4  ;;  %v1397_v6 = vpop.f32.mrf.mxu0  ;;  %v1538_v7 = vrot.slane %v1537_v2, 4  ;;  %v5840_v8 = vpop.f32.mrf.mxu1 }
 0x180   :  { %v1610_v9 = vsel %vm1494_vm0, %v1570_v0, 0.0  ;;  %v1571_v10 = vmul.f32 %v5831_v61, %v5831_v61  ;;  %v1544_v11 = vsel %vm1494_vm0, %v5840_v8, 0.0  ;;  %v1572_v12 = vmul.f32 %v5840_v8, %v5840_v8 }
 0x181   :  { %v1526_v13 = vrot.slane %v1525_v3, 2  ;;  %v1605_v15 = vadd.f32 %v1604_v4, %v1603_v62  ;;  %v1532_v16 = vadd.f32 %v1531_v5, %v1530_v63  ;;  %v1611_v18 = vrot.slane %v1610_v9, 4  ;;  %v1398_v19 = vpop.f32.mrf.mxu0  ;;  %v1438_v20 = vpop.f32.mrf.mxu1 }
 0x182   :  { %v1539_v21 = vadd.f32 %v1538_v7, %v1537_v2  ;;  %v1617_v22 = vsel %vm1494_vm0, %v1571_v10, 0.0  ;;  %v1545_v23 = vrot.slane %v1544_v11, 4  ;;  %v1624_v24 = vsel %vm1494_vm0, %v1572_v12, 0.0  ;;  %v1490_v20 = vld [vmem:[%s6075_s2 + $0x40] sm:$0xf] }
 0x183   :  { %v1527_v25 = vadd.f32 %v1526_v13, %v1525_v3  ;;  %v1606_v26 = vrot.slane %v1605_v15, 2  ;;  %v1533_v27 = vrot.slane %v1532_v16, 2  ;;  %v1612_v28 = vadd.f32 %v1611_v18, %v1610_v9  ;;  %v1439_v29 = vpop.f32.mrf.mxu1 }
 0x184   :  { %v1540_v30 = vrot.slane %v1539_v21, 2  ;;  %v1618_v31 = vrot.slane %v1617_v22, 4  ;;  %v1546_v32 = vadd.f32 %v1545_v23, %v1544_v11  ;;  %v1625_v33 = vrot.slane %v1624_v24, 4  ;;  %v5855_v11 = vld [vmem:[%s6075_s2 + $0x30] sm:$0xf] }
 0x185   :  { %v1607_v34 = vadd.f32 %v1606_v26, %v1605_v15  ;;  %v1534_v35 = vadd.f32 %v1533_v27, %v1532_v16  ;;  %v1613_v36 = vrot.slane %v1612_v28, 2  ;;  %v1528_v44 = vrot.slane %v1527_v25, 1  ;;  %v1491_v16 = vld [vmem:[%s6075_s2 + $0x48] sm:$0xf] }
 0x186   :  { %v1541_v38 = vadd.f32 %v1540_v30, %v1539_v21  ;;  %v1619_v39 = vadd.f32 %v1618_v31, %v1617_v22  ;;  %v1547_v40 = vrot.slane %v1546_v32, 2  ;;  %v1626_v43 = vadd.f32 %v1625_v33, %v1624_v24 }
 0x187   :  { %v1535_v1 = vrot.slane %v1534_v35, 1  ;;  %v1614_v46 = vadd.f32 %v1613_v36, %v1612_v28  ;;  %v1608_v48 = vrot.slane %v1607_v34, 1  ;;  %v1529_v4 = vadd.f32 %v1528_v44, %v1527_v25 }
 0x188   :  { %v1542_v49 = vrot.slane %v1541_v38, 1  ;;  %v1620_v51 = vrot.slane %v1619_v39, 2  ;;  %v1548_v53 = vadd.f32 %v1547_v40, %v1546_v32  ;;  %v1627_v57 = vrot.slane %v1626_v43, 2 }
 0x189   :  { %v1615_v58 = vrot.slane %v1614_v46, 1  ;;  %v1609_v62 = vadd.f32 %v1608_v48, %v1607_v34  ;;  %v1536_v2 = vadd.f32 %v1535_v1, %v1534_v35 }
 0x18a   :  { %v1621_v59 = vadd.f32 %v1620_v51, %v1619_v39  ;;  %v1549_v63 = vrot.slane %v1548_v53, 1  ;;  %v1628_v0 = vadd.f32 %v1627_v57, %v1626_v43  ;;  %v1543_v7 = vadd.f32 %v1542_v49, %v1541_v38 }
 0x18b   :  { %v1616_v3 = vadd.f32 %v1615_v58, %v1614_v46  ;;  %v1650_v12 = vsel %vm1645_vm1, %v1529_v4, %v1609_v62 }
 0x18c   :  { %v1550_v5 = vadd.f32 %v1549_v63, %v1548_v53  ;;  %v1629_v6 = vrot.slane %v1628_v0, 1  ;;  %v1622_v9 = vrot.slane %v1621_v59, 1 }
 0x18d   :  { %v1651_v10 = vsel %vm1645_vm1, %v1536_v2, %v1616_v3 }
 0x18e   :  { %1860 = vmatprep.mubr.f32.mxu1 %v1651_v10  ;;  %v1630_v13 = vadd.f32 %v1629_v6, %v1628_v0  ;;  %v1623_v15 = vadd.f32 %v1622_v9, %v1621_v59 }
 0x18f   :  { %1861 = vmatmul.mubr.f32.vlgmr.msra.gmra.mxu1 %v1650_v12  ;;  %v5500_v12 = vmov 0.0  }
 0x190   :  { %1897 = vmatpush1.xpose.msra.mxu1 %v5855_v11  ;;  %v1653_v18 = vsel %vm1645_vm1, %v1550_v5, %v1630_v13  ;;  %v1652_v19 = vsel %vm1645_vm1, %v1543_v7, %v1623_v15 }
 0x191   :  { %1930 = vmatprep.mubr.f32.mxu1 %v1653_v18  ;;  %1966 = vmatprep.subr.mxu1 %v1491_v16 }
 0x193   :  { %1931 = vmatmul.mubr.f32.vlgmr.msra.gmra.mxu1 %v1652_v19 }
 0x194   :  { %1967 = vmatpush1.xpose.msra.mxu1 %v1490_v20 }
 0x195   :  { %4706 = vmatprep.subr.msk.mxu1 %vm2029_vm2, %v5751_v47 }
 0x1bb   :  { %v1475_v21 = vpop.f32.mrf.mxu0 }
 0x1bc   :  { %v1551_v22 = vsel %vm1494_vm0, %v1475_v21, 0.0  ;;  %v1573_v23 = vmul.f32 %v1475_v21, %v1475_v21 }
 0x1bd   :  { %v1552_v24 = vrot.slane %v1551_v22, 4  ;;  %v1477_v25 = vpop.f32.mrf.mxu0 }
 0x1be   :  { %v1631_v26 = vsel %vm1494_vm0, %v1573_v23, 0.0  ;;  %v1558_v27 = vsel %vm1494_vm0, %v1477_v25, 0.0  ;;  %v1574_v28 = vmul.f32 %v1477_v25, %v1477_v25 }
 0x1bf   :  { %v1553_v29 = vadd.f32 %v1552_v24, %v1551_v22  ;;  %v1632_v30 = vrot.slane %v1631_v26, 4  ;;  %v1559_v31 = vrot.slane %v1558_v27, 4  ;;  %v1479_v32 = vpop.f32.mrf.mxu0 }
 0x1c0   :  { %v1638_v33 = vsel %vm1494_vm0, %v1574_v28, 0.0 }
 0x1c1   :  { %v1554_v34 = vrot.slane %v1553_v29, 2  ;;  %v1633_v35 = vadd.f32 %v1632_v30, %v1631_v26  ;;  %v1560_v36 = vadd.f32 %v1559_v31, %v1558_v27  ;;  %v1639_v38 = vrot.slane %v1638_v33, 4  ;;  %v1480_v39 = vpop.f32.mrf.mxu0  ;;  %v1493_v31 = vld [vmem:[%s6075_s2 + $0x5] ss:$0 sm:$0xff] }
 0x1c3   :  { %v1634_v40 = vrot.slane %v1633_v35, 2  ;;  %v1561_v43 = vrot.slane %v1560_v36, 2  ;;  %v1640_v44 = vadd.f32 %v1639_v38, %v1638_v33  ;;  %v1555_v1 = vadd.f32 %v1554_v34, %v1553_v29 }
 0x1c5   :  { %v1635_v46 = vadd.f32 %v1634_v40, %v1633_v35  ;;  %v1562_v48 = vadd.f32 %v1561_v43, %v1560_v36  ;;  %v1641_v49 = vrot.slane %v1640_v44, 2  ;;  %v1556_v58 = vrot.slane %v1555_v1, 1 }
 0x1c7   :  { %v1636_v51 = vrot.slane %v1635_v46, 1  ;;  %v1563_v53 = vrot.slane %v1562_v48, 1  ;;  %v1642_v57 = vadd.f32 %v1641_v49, %v1640_v44  ;;  %v1557_v2 = vadd.f32 %v1556_v58, %v1555_v1 }
 0x1c9   :  { %v1643_v59 = vrot.slane %v1642_v57, 1  ;;  %v1637_v62 = vadd.f32 %v1636_v51, %v1635_v46  ;;  %v1564_v63 = vadd.f32 %v1563_v53, %v1562_v48 }
 0x1cb   :  { %v1644_v0 = vadd.f32 %v1643_v59, %v1642_v57  ;;  %v1654_v4 = vsel %vm1645_vm1, %v1557_v2, %v1637_v62 }
 0x1cd   :  { %v1655_v3 = vsel %vm1645_vm1, %v1564_v63, %v1644_v0 }
 0x1ce   :  { %2000 = vmatprep.mubr.f32.mxu1 %v1655_v3 }
 0x1cf   :  { %2001 = vmatmul.mubr.f32.vlgmr.msra.gmra.mxu1 %v1654_v4 }
 0x1d0   :  { %2118 = vmatprep.mubr.f32.mxu1 %v5500_v12  ;;  %4707 = vmatpush1.msk.msra.mxu1 %vm2029_vm2, %v5756_v14  ;;  %v1492_v14 = vld [vmem:[%s6075_s2 + $0x4] ss:$0 sm:$0xff] }
 0x1d1   :  { %4709 = vmatprep.subr.msk.mxu1 %vm2029_vm2, %v5763_v17 }
 0x20f   :  { %v1722_v5 = vpop.f32.mrf.mxu1 }
 0x211   :  { %v1724_v6 = vpop.f32.mrf.mxu1 }
 0x213   :  { %v1792_v7 = vpop.f32.mrf.mxu1 }
 0x214   :  { %v1793_v9 = vadd.f32 %v1792_v7, %v1722_v5 }
 0x215   :  { %v1794_v10 = vpop.f32.mrf.mxu1 }
 0x24f   :  { %v1862_v13 = vpop.f32.mrf.mxu1 }
 0x250   :  { %v1863_v19 = vadd.f32 %v1862_v13, %v1793_v9 }
 0x251   :  { %v1864_v15 = vpop.f32.mrf.mxu1 }
 0x253   :  { %v1932_v16 = vpop.f32.mrf.mxu1 }
 0x254   :  { %v1933_v20 = vadd.f32 %v1932_v16, %v1863_v19 }
 0x255   :  { %v1934_v18 = vpop.f32.mrf.mxu1 }
 0x28f   :  { %v2002_v21 = vpop.f32.mrf.mxu1 }
 0x290   :  { %v2003_v22 = vadd.f32 %v2002_v21, %v1933_v20 }
 0x291   :  { %v2004_v23 = vpop.f32.mrf.mxu1 }
 0x292   :  { %v2006_v24 = vmul.f32 0.0017301039, %v2003_v22 }
 0x294   :  { %v2007_v47 = vmul.f32 %v2006_v24, %v2006_v24 }
 0x296   :  { %v2009_v25 = vrot.slane %v2007_v47, 7 }
 0x298   :  { %v2011_v26 = vsub.f32 %v2006_v24, %v2009_v25 }
 0x29a   :  { %v2012_v27 = vmax.f32 %v2011_v26, 0.0 }
 0x29c   :  { %v2013_v28 = vadd.f32 1e-05, %v2012_v27 }
 0x29e   :  { %5218 = vrsqrt.f32 %v2013_v28 }
 0x2ab   :  { %v5219_v17 = vpop.eup %5218 }
 0x2ac   :  { %v2015_v29 = vmul.f32 %v5219_v17, %v1492_v14 }
 0x2ae   :  { %v2017_v30 = vrot.slane %v2015_v29, 1 }
 0x2b0   :  { %v2019_v32 = vmul.f32 %v2017_v30, %v2006_v24 }
 0x2b2   :  { %v2020_v33 = vsub.f32 %v1493_v31, %v2019_v32 }
 0x2b4   :  { %v2022_v34 = vrot.slane %v2020_v33, 7 }
 0x2b6   :  { %v2024_v35 = vsel %vm1645_vm1, %v2017_v30, %v2022_v34 }
 0x2b7   :  { %4708 = vmatmul.mubr.msk.f32.vlgmr.msra.gmra.mxu1 %vm2025_vm3, %v2024_v35 }
 0x2b8   :  { %4710 = vmatpush1.msk.msra.mxu1 %vm2029_vm2, %v5799_v45  ;;  %2189 = vmatprep.mubr.f32.mxu1 %v5500_v12  ;;  %v2338_v45 = vlaneseq }
 0x2b9   :  { %4712 = vmatprep.subr.msk.mxu1 %vm2029_vm2, %v5805_v50 }
 0x2ba   :  { %v2339_v36 = vshrl.u32 %v2338_v45, 7 }
 0x2bb   :  { %4711 = vmatmul.mubr.msk.f32.vlgmr.msra.gmra.mxu1 %vm2025_vm3, %v2024_v35 }
 0x2bc   :  { %4713 = vmatpush1.msk.msra.mxu1 %vm2029_vm2, %v5814_v54  ;;  %2260 = vmatprep.mubr.f32.mxu1 %v5500_v12  ;;  %v5900_v50 = vsub.s32 0, %v2339_v36  ;;  %v5905_v44 = vsub.s32 1, %v2339_v36 }
 0x2bd   :  { %4715 = vmatprep.subr.msk.mxu1 %vm2029_vm2, %v5819_v55 }
 0x2bf   :  { %4714 = vmatmul.mubr.msk.f32.vlgmr.msra.gmra.mxu1 %vm2025_vm3, %v2024_v35 }
 0x2c0   :  { %4716 = vmatpush1.msk.msra.mxu1 %vm2029_vm2, %v5855_v11  ;;  %2331 = vmatprep.mubr.f32.mxu1 %v5500_v12 }
 0x2c3   :  { %4717 = vmatmul.mubr.msk.f32.vlgmr.msra.gmra.mxu1 %vm2025_vm3, %v2024_v35 }
 0x377   :  { %v2120_v38 = vpop.f32.mrf.mxu1 }
 0x378   :  { %v2341_v54 = vrot.slane %v2120_v38, %v5900_v50  ;;  %v2381_v62 = vrot.slane %v2120_v38, %v5905_v44 }
 0x379   :  { %v2122_v39 = vpop.f32.mrf.mxu1 }
 0x37a   :  { %v2345_v43 = vrot.slane %v2122_v39, %v5900_v50  ;;  %v2370_v48 = vmul.f32 %v2341_v54, %v5767_v37  ;;  %v2385_v63 = vrot.slane %v2122_v39, %v5905_v44 }
 0x37b   :  { %v2191_v40 = vpop.f32.mrf.mxu1 }
 0x37c   :  { %v2349_v55 = vrot.slane %v2191_v40, %v5900_v50  ;;  %v2389_v49 = vrot.slane %v2191_v40, %v5905_v44  ;;  %v2371_v53 = vmul.f32 %v2345_v43, %v5773_v41  ;;  %v2410_v41 = vadd.f32 %v2381_v62, %v2370_v48 }
 0x37d   :  { %v2193_v1 = vpop.f32.mrf.mxu1 }
 0x37e   :  { %v2372_v11 = vmul.f32 %v2349_v55, %v5775_v42  ;;  %v2353_v46 = vrot.slane %v2193_v1, %v5900_v50  ;;  %v2393_v58 = vrot.slane %v2193_v1, %v5905_v44  ;;  %v2418_v19 = vmax.f32 %v2410_v41, 0.0 }
 0x37f   :  { %v2262_v51 = vpop.f32.mrf.mxu1 }
 0x380   :  { %v2373_v57 = vmul.f32 %v2353_v46, %v5784_v52  ;;  %v2357_v59 = vrot.slane %v2262_v51, %v5900_v50  ;;  %v2412_v42 = vadd.f32 %v2389_v49, %v2372_v11  ;;  %v2397_v3 = vrot.slane %v2262_v51, %v5905_v44 }
 0x381   :  { %v2264_v0 = vpop.f32.mrf.mxu1  ;;  %v2411_v52 = vadd.f32 %v2385_v63, %v2371_v53 }
 0x382   :  { %v2413_v2 = vadd.f32 %v2393_v58, %v2373_v57  ;;  %v2374_v37 = vmul.f32 %v2357_v59, %v5823_v56  ;;  %v2361_v4 = vrot.slane %v2264_v0, %v5900_v50  ;;  %v2401_v9 = vrot.slane %v2264_v0, %v5905_v44 }
 0x383   :  { %v2333_v5 = vpop.f32.mrf.mxu1  ;;  %v2420_v10 = vmax.f32 %v2412_v42, 0.0  ;;  %v2419_v23 = vmax.f32 %v2411_v52, 0.0 }
 0x384   :  { %v2414_v6 = vadd.f32 %v2397_v3, %v2374_v37  ;;  %v2375_v7 = vmul.f32 %v2361_v4, %v5829_v60  ;;  %v2365_v13 = vrot.slane %v2333_v5, %v5900_v50  ;;  %v2421_v16 = vmax.f32 %v2413_v2, 0.0 }
 0x385   :  { %v2335_v15 = vpop.f32.mrf.mxu1  ;;  %v2405_v22 = vrot.slane %v2333_v5, %v5905_v44  ;;  %v2426_v25 = vadd.f32 %v2420_v10, %v2418_v19 }
 0x386   :  { %v2415_v18 = vadd.f32 %v2401_v9, %v2375_v7  ;;  %v2369_v56 = vrot.slane %v2335_v15, %v5900_v50  ;;  %v2422_v20 = vmax.f32 %v2414_v6, 0.0  ;;  %v2376_v21 = vmul.f32 %v2365_v13, %v5831_v61 }
 0x387   :  { %v2409_v47 = vrot.slane %v2335_v15, %v5905_v44  ;;  %v2427_v27 = vadd.f32 %v2421_v16, %v2419_v23 }
 0x388   :  { %v2423_v24 = vmax.f32 %v2415_v18, 0.0  ;;  %v2377_v60 = vmul.f32 %v2369_v56, %v5840_v8  ;;  %v2416_v26 = vadd.f32 %v2405_v22, %v2376_v21  ;;  %v2428_v14 = vadd.f32 %v2426_v25, %v2422_v20 }
 0x38a   :  { %v2417_v28 = vadd.f32 %v2409_v47, %v2377_v60  ;;  %v2424_v17 = vmax.f32 %v2416_v26, 0.0  ;;  %v2429_v29 = vadd.f32 %v2427_v27, %v2423_v24 }
 0x38c   :  { %v2425_v30 = vmax.f32 %v2417_v28, 0.0  ;;  %v2430_v31 = vadd.f32 %v2428_v14, %v2424_v17 }
 0x38e   :  { %v2431_v32 = vadd.f32 %v2429_v29, %v2425_v30  ;;  %v5928_v33 = vmul.f32 0.25, %v2430_v31 }
 0x390   :  { %v2433_v61 = vmul.f32 0.25, %v2431_v32 }
 0x391   :  { %5486 = dma.done.wait [#allocation6], 12288 }
 0x392   :  { %5487 = vsyncadd [#allocation6], 4294955008 }
 0x393   :  { %5488 = dma.done.wait [#allocation6 + $0x1], 1536 }
 0x394   :  { %5489 = vsyncadd [#allocation6 + $0x1], 4294965760  ;;  %v5930_v8 = vpack.c.bf16 %v2433_v61, %v2433_v61  ;;  %v5220_v34 = vld [vmem:[#allocation2 + $0x154] ss:$24 sps:$4 sm:$0xff]   ;;  %v5222_v35 = vld [vmem:[#allocation2 + $0x150] ss:$24 sps:$4 sm:$0xff]  }
 0x395   :  { %3020 = vmatprep.subr.bf16.mxu1 %v5220_v34  ;;  %v5223_v45 = vld [vmem:[#allocation2 + $0x124] ss:$24 sps:$4 sm:$0xff]   ;;  %v5227_v38 = vld [vmem:[#allocation2 + $0x120] ss:$24 sps:$4 sm:$0xff]   ;;  %v5229_v54 = vld [vmem:[#allocation2 + $0xf4] ss:$24 sps:$4 sm:$0xff]  }
 0x396   :  { %3052 = vmatprep.mubr.bf16.mxu1 %v5930_v8  ;;  %3093 = vmatprep.mubr.bf16.mxu0 %v5930_v8  ;;  %v5225_v36 = vld [vmem:[#allocation2 + $0x15c] ss:$24 sps:$4 sm:$0xff]   ;;  %v5228_v39 = vld [vmem:[#allocation2 + $0x158] ss:$24 sps:$4 sm:$0xff]   ;;  %v5231_v40 = vld [vmem:[#allocation2 + $0x12c] ss:$24 sps:$4 sm:$0xff]  }
 0x397   :  { %3021 = vmatpush1.bf16.msra.mxu1 %v5222_v35  ;;  %3061 = vmatprep.subr.bf16.mxu0 %v5225_v36  ;;  %v5234_v43 = vld [vmem:[#allocation2 + $0x128] ss:$24 sps:$4 sm:$0xff]   ;;  %v5235_v1 = vld [vmem:[#allocation2 + $0xc4] ss:$24 sps:$4 sm:$0xff]   ;;  %v5240_v46 = vld [vmem:[#allocation2 + $0xf8] ss:$24 sps:$4 sm:$0xff]  }
 0x398   :  { %3022 = vmatprep.subr.bf16.mxu1 %v5223_v45  ;;  %3062 = vmatpush1.bf16.msra.mxu0 %v5228_v39  ;;  %v5233_v55 = vld [vmem:[#allocation2 + $0xf0] ss:$24 sps:$4 sm:$0xff]   ;;  %v5237_v11 = vld [vmem:[#allocation2 + $0xfc] ss:$24 sps:$4 sm:$0xff]   ;;  %v5239_v48 = vld [vmem:[#allocation2 + $0xc0] ss:$24 sps:$4 sm:$0xff]   ;;  %v5936_v39 = vpack.c.bf16 %v5928_v33, %v5928_v33 }
 0x399   :  { %3063 = vmatprep.subr.bf16.mxu0 %v5231_v40  ;;  %v5243_v49 = vld [vmem:[#allocation2 + $0xcc] ss:$24 sps:$4 sm:$0xff]   ;;  %v5245_v53 = vld [vmem:[#allocation2 + $0x90] ss:$24 sps:$4 sm:$0xff]   ;;  %v5249_v58 = vld [vmem:[#allocation2 + $0x9c] ss:$24 sps:$4 sm:$0xff]  }
 0x39a   :  { %v5241_v51 = vld [vmem:[#allocation2 + $0x94] ss:$24 sps:$4 sm:$0xff]   ;;  %v5246_v57 = vld [vmem:[#allocation2 + $0xc8] ss:$24 sps:$4 sm:$0xff]   ;;  %v5247_v59 = vld [vmem:[#allocation2 + $0x64] ss:$24 sps:$4 sm:$0xff]  }
 0x39b   :  { %3023 = vmatpush1.bf16.msra.mxu1 %v5227_v38  ;;  %v5252_v62 = vld [vmem:[#allocation2 + $0x98] ss:$24 sps:$4 sm:$0xff]   ;;  %v5255_v42 = vld [vmem:[#allocation2 + $0x6c] ss:$24 sps:$4 sm:$0xff]   ;;  %v5258_v37 = vld [vmem:[#allocation2 + $0x68] ss:$24 sps:$4 sm:$0xff]  }
 0x39c   :  { %3024 = vmatprep.subr.bf16.mxu1 %v5229_v54  ;;  %3064 = vmatpush1.bf16.msra.mxu0 %v5234_v43  ;;  %v5251_v63 = vld [vmem:[#allocation2 + $0x60] ss:$24 sps:$4 sm:$0xff]   ;;  %v5253_v0 = vld [vmem:[#allocation2 + $0x34] ss:$24 sps:$4 sm:$0xff]   ;;  %v5257_v2 = vld [vmem:[#allocation2 + $0x30] ss:$24 sps:$4 sm:$0xff]  }
 0x39d   :  { %3065 = vmatprep.subr.bf16.mxu0 %v5237_v11  ;;  %v5261_v3 = vld [vmem:[#allocation2 + $0x3c] ss:$24 sps:$4 sm:$0xff]   ;;  %v5264_v41 = vld [vmem:[#allocation2 + $0x38] ss:$24 sps:$4 sm:$0xff]   ;;  %v5267_v52 = vld [vmem:[#allocation2 + $0xc] ss:$24 sps:$4 sm:$0xff]  }
 0x39e   :  { %v5259_v4 = vld [vmem:[#allocation2 + $0x4] ss:$24 sps:$4 sm:$0xff]   ;;  %v5263_v5 = vld [vmem:[#allocation2] ss:$24 sps:$4 sm:$0xff]   ;;  %v5265_v6 = vld [vmem:[#allocation2 + $0x2d4] ss:$24 sps:$4 sm:$0xff]  }
 0x39f   :  { %3025 = vmatpush1.bf16.msra.mxu1 %v5233_v55  ;;  %v5269_v7 = vld [vmem:[#allocation2 + $0x2d0] ss:$24 sps:$4 sm:$0xff]   ;;  %v5273_v10 = vld [vmem:[#allocation2 + $0x2dc] ss:$24 sps:$4 sm:$0xff]   ;;  %v5275_v16 = vld [vmem:[#allocation2 + $0x2a0] ss:$24 sps:$4 sm:$0xff]  }
 0x3a0   :  { %3026 = vmatprep.subr.bf16.mxu1 %v5235_v1  ;;  %3066 = vmatpush1.bf16.msra.mxu0 %v5240_v46  ;;  %v5270_v9 = vld [vmem:[#allocation2 + $0x8] ss:$24 sps:$4 sm:$0xff]   ;;  %v5271_v13 = vld [vmem:[#allocation2 + $0x2a4] ss:$24 sps:$4 sm:$0xff]   ;;  %v5276_v15 = vld [vmem:[#allocation2 + $0x2d8] ss:$24 sps:$4 sm:$0xff]  }
 0x3a1   :  { %3067 = vmatprep.subr.bf16.mxu0 %v5243_v49  ;;  %v5279_v18 = vld [vmem:[#allocation2 + $0x2ac] ss:$24 sps:$4 sm:$0xff]   ;;  %v5281_v19 = vld [vmem:[#allocation2 + $0x270] ss:$24 sps:$4 sm:$0xff]   ;;  %v5285_v21 = vld [vmem:[#allocation2 + $0x27c] ss:$24 sps:$4 sm:$0xff]  }
 0x3a2   :  { %v5277_v56 = vld [vmem:[#allocation2 + $0x274] ss:$24 sps:$4 sm:$0xff]   ;;  %v5282_v20 = vld [vmem:[#allocation2 + $0x2a8] ss:$24 sps:$4 sm:$0xff]   ;;  %v5283_v22 = vld [vmem:[#allocation2 + $0x244] ss:$24 sps:$4 sm:$0xff]  }
 0x3a3   :  { %3027 = vmatpush1.bf16.msra.mxu1 %v5239_v48  ;;  %v5288_v23 = vld [vmem:[#allocation2 + $0x278] ss:$24 sps:$4 sm:$0xff]   ;;  %v5291_v60 = vld [vmem:[#allocation2 + $0x24c] ss:$24 sps:$4 sm:$0xff]   ;;  %v5294_v25 = vld [vmem:[#allocation2 + $0x248] ss:$24 sps:$4 sm:$0xff]  }
 0x3a4   :  { %3028 = vmatprep.subr.bf16.mxu1 %v5241_v51  ;;  %3068 = vmatpush1.bf16.msra.mxu0 %v5246_v57  ;;  %v5287_v24 = vld [vmem:[#allocation2 + $0x240] ss:$24 sps:$4 sm:$0xff]   ;;  %v5289_v47 = vld [vmem:[#allocation2 + $0x214] ss:$24 sps:$4 sm:$0xff]   ;;  %v5293_v26 = vld [vmem:[#allocation2 + $0x210] ss:$24 sps:$4 sm:$0xff]  }
 0x3a5   :  { %3069 = vmatprep.subr.bf16.mxu0 %v5249_v58  ;;  %v5297_v27 = vld [vmem:[#allocation2 + $0x21c] ss:$24 sps:$4 sm:$0xff]   ;;  %v5300_v14 = vld [vmem:[#allocation2 + $0x218] ss:$24 sps:$4 sm:$0xff]   ;;  %v5303_v29 = vld [vmem:[#allocation2 + $0x1ec] ss:$24 sps:$4 sm:$0xff]  }
 0x3a6   :  { %v5295_v28 = vld [vmem:[#allocation2 + $0x1e4] ss:$24 sps:$4 sm:$0xff]   ;;  %v5299_v17 = vld [vmem:[#allocation2 + $0x1e0] ss:$24 sps:$4 sm:$0xff]   ;;  %v5301_v30 = vld [vmem:[#allocation2 + $0x1b4] ss:$24 sps:$4 sm:$0xff]  }
 0x3a7   :  { %3029 = vmatpush1.bf16.msra.mxu1 %v5245_v53  ;;  %v5306_v31 = vld [vmem:[#allocation2 + $0x1e8] ss:$24 sps:$4 sm:$0xff]   ;;  %v5309_v61 = vld [vmem:[#allocation2 + $0x1bc] ss:$24 sps:$4 sm:$0xff]   ;;  %v5312_v35 = vld [vmem:[#allocation2 + $0x1b8] ss:$24 sps:$4 sm:$0xff]  }
 0x3a8   :  { %3030 = vmatprep.subr.bf16.mxu1 %v5247_v59  ;;  %3070 = vmatpush1.bf16.msra.mxu0 %v5252_v62  ;;  %v5305_v32 = vld [vmem:[#allocation2 + $0x1b0] ss:$24 sps:$4 sm:$0xff]   ;;  %v5307_v34 = vld [vmem:[#allocation2 + $0x184] ss:$24 sps:$4 sm:$0xff]   ;;  %v5311_v45 = vld [vmem:[#allocation2 + $0x180] ss:$24 sps:$4 sm:$0xff]  }
 0x3a9   :  { %3071 = vmatprep.subr.bf16.mxu0 %v5255_v42  ;;  %v5313_v36 = vld [vmem:[#allocation2 + $0x18c] ss:$24 sps:$4 sm:$0xff]   ;;  %v5318_v54 = vld [vmem:[#allocation2 + $0x188] ss:$24 sps:$4 sm:$0xff]   ;;  %vm3476_vm4 = vcmask 64512  }
 0x3aa   :  { %v5317_v38 = vld [vmem:[#allocation2 + $0x164] ss:$24 sps:$4 sm:$0xff]   ;;  %v5315_v40 = vld [vmem:[#allocation2 + $0x160] ss:$24 sps:$4 sm:$0xff]   ;;  %v5321_v43 = vld [vmem:[#allocation2 + $0x134] ss:$24 sps:$4 sm:$0xff]  }
 0x3ab   :  { %3031 = vmatpush1.bf16.msra.mxu1 %v5251_v63  ;;  %v5319_v55 = vld [vmem:[#allocation2 + $0x130] ss:$24 sps:$4 sm:$0xff]   ;;  %v5324_v1 = vld [vmem:[#allocation2 + $0x104] ss:$24 sps:$4 sm:$0xff]   ;;  %v5322_v33 = vld [vmem:[#allocation2 + $0x100] ss:$24 sps:$4 sm:$0xff]  }
 0x3ac   :  { %3032 = vmatprep.subr.bf16.mxu1 %v5253_v0  ;;  %3072 = vmatpush1.bf16.msra.mxu0 %v5258_v37  ;;  %v5327_v11 = vld [vmem:[#allocation2 + $0xd4] ss:$24 sps:$4 sm:$0xff]   ;;  %v5325_v46 = vld [vmem:[#allocation2 + $0xd0] ss:$24 sps:$4 sm:$0xff]   ;;  %v5330_v48 = vld [vmem:[#allocation2 + $0xa4] ss:$24 sps:$4 sm:$0xff]  }
 0x3ad   :  { %3073 = vmatprep.subr.bf16.mxu0 %v5261_v3  ;;  %v5328_v49 = vld [vmem:[#allocation2 + $0xa0] ss:$24 sps:$4 sm:$0xff]   ;;  %v5333_v51 = vld [vmem:[#allocation2 + $0x74] ss:$24 sps:$4 sm:$0xff]   ;;  %v5331_v53 = vld [vmem:[#allocation2 + $0x70] ss:$24 sps:$4 sm:$0xff]  }
 0x3ae   :  { %v5334_v57 = vld [vmem:[#allocation2 + $0x40] ss:$24 sps:$4 sm:$0xff]   ;;  %v5339_v58 = vld [vmem:[#allocation2 + $0x14] ss:$24 sps:$4 sm:$0xff]   ;;  %v5337_v59 = vld [vmem:[#allocation2 + $0x10] ss:$24 sps:$4 sm:$0xff]  }
 0x3af   :  { %3033 = vmatpush1.bf16.msra.mxu1 %v5257_v2  ;;  %v5342_v62 = vld [vmem:[#allocation2 + $0x2e4] ss:$24 sps:$4 sm:$0xff]   ;;  %v5340_v63 = vld [vmem:[#allocation2 + $0x2e0] ss:$24 sps:$4 sm:$0xff]   ;;  %v5345_v42 = vld [vmem:[#allocation2 + $0x2b4] ss:$24 sps:$4 sm:$0xff]  }
 0x3b0   :  { %3034 = vmatprep.subr.bf16.mxu1 %v5259_v4  ;;  %3074 = vmatpush1.bf16.msra.mxu0 %v5264_v41  ;;  %v5343_v0 = vld [vmem:[#allocation2 + $0x2b0] ss:$24 sps:$4 sm:$0xff]   ;;  %v5348_v2 = vld [vmem:[#allocation2 + $0x284] ss:$24 sps:$4 sm:$0xff]   ;;  %v5346_v37 = vld [vmem:[#allocation2 + $0x280] ss:$24 sps:$4 sm:$0xff]  }
 0x3b1   :  { %3075 = vmatprep.subr.bf16.mxu0 %v5267_v52  ;;  %v5351_v3 = vld [vmem:[#allocation2 + $0x254] ss:$24 sps:$4 sm:$0xff]   ;;  %v5349_v4 = vld [vmem:[#allocation2 + $0x250] ss:$24 sps:$4 sm:$0xff]   ;;  %v5354_v41 = vld [vmem:[#allocation2 + $0x224] ss:$24 sps:$4 sm:$0xff]  }
 0x3b2   :  { %v5357_v52 = vld [vmem:[#allocation2 + $0x1f4] ss:$24 sps:$4 sm:$0xff]  }
 0x3b3   :  { %3035 = vmatpush1.bf16.msra.mxu1 %v5263_v5  ;;  %v5352_v5 = vld [vmem:[#allocation2 + $0x220] ss:$24 sps:$4 sm:$0xff]  }
 0x3b4   :  { %3036 = vmatprep.subr.bf16.mxu1 %v5265_v6  ;;  %3076 = vmatpush1.bf16.msra.mxu0 %v5270_v9  ;;  %v5355_v6 = vld [vmem:[#allocation2 + $0x1f0] ss:$24 sps:$4 sm:$0xff]   ;;  %v5358_v9 = vld [vmem:[#allocation2 + $0x1c0] ss:$24 sps:$4 sm:$0xff]  }
 0x3b5   :  { %3077 = vmatprep.subr.bf16.mxu0 %v5273_v10  ;;  %v5363_v10 = vld [vmem:[#allocation2 + $0x194] ss:$24 sps:$4 sm:$0xff]  }
 0x3b7   :  { %3037 = vmatpush2.bf16.msra.mxu1 %v5269_v7  ;;  %v5360_v7 = vld [vmem:[#allocation2 + $0x1c4] ss:$24 sps:$4 sm:$0xff]  }
 0x3b8   :  { %3038 = vmatprep.subr.bf16.mxu1 %v5271_v13  ;;  %3078 = vmatpush2.bf16.msra.mxu0 %v5276_v15  ;;  %v5361_v13 = vld [vmem:[#allocation2 + $0x190] ss:$24 sps:$4 sm:$0xff]   ;;  %v5942_v15 = vld [vmem:[#allocation5 + $0x8] sm:$0xff] }
 0x3b9   :  { %3079 = vmatprep.subr.bf16.mxu0 %v5279_v18  ;;  %v5948_v18 = vld [vmem:[#allocation5 + $0x18] sm:$0xff] }
 0x3bb   :  { %3039 = vmatpush2.bf16.msra.mxu1 %v5275_v16  ;;  %v5944_v16 = vld [vmem:[#allocation5] sm:$0xff] }
 0x3bc   :  { %3040 = vmatprep.subr.bf16.mxu1 %v5277_v56  ;;  %3080 = vmatpush2.bf16.msra.mxu0 %v5282_v20 }
 0x3bd   :  { %3081 = vmatprep.subr.bf16.mxu0 %v5285_v21 }
 0x3bf   :  { %3041 = vmatpush2.bf16.msra.mxu1 %v5281_v19 }
 0x3c0   :  { %3042 = vmatprep.subr.bf16.mxu1 %v5283_v22  ;;  %3082 = vmatpush2.bf16.msra.mxu0 %v5288_v23 }
 0x3c1   :  { %3083 = vmatprep.subr.bf16.mxu0 %v5291_v60 }
 0x3c3   :  { %3043 = vmatpush2.bf16.msra.mxu1 %v5287_v24 }
 0x3c4   :  { %3044 = vmatprep.subr.bf16.mxu1 %v5289_v47  ;;  %3084 = vmatpush2.bf16.msra.mxu0 %v5294_v25 }
 0x3c5   :  { %3085 = vmatprep.subr.bf16.mxu0 %v5297_v27 }
 0x3c7   :  { %3045 = vmatpush2.bf16.msra.mxu1 %v5293_v26 }
 0x3c8   :  { %3046 = vmatprep.subr.bf16.mxu1 %v5295_v28  ;;  %3086 = vmatpush2.bf16.msra.mxu0 %v5300_v14 }
 0x3c9   :  { %3087 = vmatprep.subr.bf16.mxu0 %v5303_v29 }
 0x3cb   :  { %3047 = vmatpush2.bf16.msra.mxu1 %v5299_v17 }
 0x3cc   :  { %3048 = vmatprep.subr.bf16.mxu1 %v5301_v30  ;;  %3088 = vmatpush2.bf16.msra.mxu0 %v5306_v31 }
 0x3cd   :  { %3089 = vmatprep.subr.bf16.mxu0 %v5309_v61 }
 0x3cf   :  { %3049 = vmatpush2.bf16.msra.mxu1 %v5305_v32 }
 0x3d0   :  { %3050 = vmatprep.subr.bf16.mxu1 %v5307_v34  ;;  %3090 = vmatpush2.bf16.msra.mxu0 %v5312_v35 }
 0x3d1   :  { %3091 = vmatprep.subr.bf16.mxu0 %v5313_v36 }
 0x3d3   :  { %3051 = vmatpush2.bf16.msra.mxu1 %v5311_v45 }
 0x3d4   :  { %3102 = vmatprep.subr.bf16.mxu1 %v5317_v38  ;;  %3092 = vmatpush2.bf16.msra.mxu0 %v5318_v54 }
 0x3d5   :  { %3277 = vmatprep.subr.mxu0 %v5942_v15 }
 0x3d6   :  { %3053 = vmatmul.mubr.bf16.vlgmr.msra.gmra.mxu1 %v5936_v39 }
 0x3d7   :  { %3103 = vmatpush1.bf16.msra.mxu1 %v5315_v40  ;;  %3134 = vmatprep.mubr.bf16.mxu1 %v5930_v8  ;;  %v5336_v8 = vld [vmem:[#allocation2 + $0x44] ss:$24 sps:$4 sm:$0xff]  }
 0x3d8   :  { %3104 = vmatprep.subr.bf16.mxu1 %v5321_v43  ;;  %3094 = vmatmul.mubr.bf16.vlgmr.msra.gmra.mxu0 %v5936_v39 }
 0x3d9   :  { %3278 = vmatpush1.xpose.msra.mxu0 %v5944_v16 }
 0x3da   :  { %3347 = vmatprep.subr.mxu0 %v5948_v18 }
 0x3db   :  { %3105 = vmatpush1.bf16.msra.mxu1 %v5319_v55 }
 0x3dc   :  { %3106 = vmatprep.subr.bf16.mxu1 %v5324_v1 }
 0x3df   :  { %3107 = vmatpush1.bf16.msra.mxu1 %v5322_v33 }
 0x3e0   :  { %3108 = vmatprep.subr.bf16.mxu1 %v5327_v11 }
 0x3e3   :  { %3109 = vmatpush1.bf16.msra.mxu1 %v5325_v46 }
 0x3e4   :  { %3110 = vmatprep.subr.bf16.mxu1 %v5330_v48 }
 0x3e7   :  { %3111 = vmatpush1.bf16.msra.mxu1 %v5328_v49 }
 0x3e8   :  { %3112 = vmatprep.subr.bf16.mxu1 %v5333_v51 }
 0x3eb   :  { %3113 = vmatpush1.bf16.msra.mxu1 %v5331_v53 }
 0x3ec   :  { %3114 = vmatprep.subr.bf16.mxu1 %v5336_v8 }
 0x3ef   :  { %3115 = vmatpush1.bf16.msra.mxu1 %v5334_v57 }
 0x3f0   :  { %3116 = vmatprep.subr.bf16.mxu1 %v5339_v58 }
 0x3f3   :  { %3117 = vmatpush1.bf16.msra.mxu1 %v5337_v59 }
 0x3f4   :  { %3118 = vmatprep.subr.bf16.mxu1 %v5342_v62 }
 0x3f7   :  { %3119 = vmatpush2.bf16.msra.mxu1 %v5340_v63 }
 0x3f8   :  { %3120 = vmatprep.subr.bf16.mxu1 %v5345_v42 }
 0x3fb   :  { %3121 = vmatpush2.bf16.msra.mxu1 %v5343_v0 }
 0x3fc   :  { %3122 = vmatprep.subr.bf16.mxu1 %v5348_v2 }
 0x3ff   :  { %3123 = vmatpush2.bf16.msra.mxu1 %v5346_v37 }
 0x400   :  { %3124 = vmatprep.subr.bf16.mxu1 %v5351_v3 }
 0x403   :  { %3125 = vmatpush2.bf16.msra.mxu1 %v5349_v4 }
 0x404   :  { %3126 = vmatprep.subr.bf16.mxu1 %v5354_v41 }
 0x407   :  { %3127 = vmatpush2.bf16.msra.mxu1 %v5352_v5 }
 0x408   :  { %3128 = vmatprep.subr.bf16.mxu1 %v5357_v52 }
 0x40b   :  { %3129 = vmatpush2.bf16.msra.mxu1 %v5355_v6 }
 0x40c   :  { %3130 = vmatprep.subr.bf16.mxu1 %v5360_v7 }
 0x40f   :  { %3131 = vmatpush2.bf16.msra.mxu1 %v5358_v9 }
 0x410   :  { %3132 = vmatprep.subr.bf16.mxu1 %v5363_v10 }
 0x413   :  { %3133 = vmatpush2.bf16.msra.mxu1 %v5361_v13 }
 0x416   :  { %3135 = vmatmul.mubr.bf16.vlgmr.msra.gmra.mxu1 %v5936_v39 }
 0x496   :  { %v5951_v56 = vpop.f32.mrf.mxu1 }
 0x497   :  { %v3151_v19 = vsel %vm1494_vm0, %v5951_v56, 0.0  ;;  %v3193_v20 = vmul.f32 %v5951_v56, %v5951_v56 }
 0x498   :  { %v3152_v21 = vrot.slane %v3151_v19, 4  ;;  %v5957_v22 = vpop.f32.mrf.mxu1  ;;  %v5964_v47 = vpop.f32.mrf.mxu0 }
 0x499   :  { %v3199_v23 = vsel %vm1494_vm0, %v3193_v20, 0.0  ;;  %v3158_v24 = vsel %vm1494_vm0, %v5957_v22, 0.0  ;;  %v3194_v60 = vmul.f32 %v5957_v22, %v5957_v22  ;;  %v3165_v14 = vsel %vm1494_vm0, %v5964_v47, 0.0 }
 0x49a   :  { %v3153_v25 = vadd.f32 %v3152_v21, %v3151_v19  ;;  %v3200_v26 = vrot.slane %v3199_v23, 4  ;;  %v3159_v27 = vrot.slane %v3158_v24, 4  ;;  %v3058_v28 = vpop.f32.mrf.mxu1  ;;  %v3166_v29 = vrot.slane %v3165_v14, 4  ;;  %v5971_v31 = vpop.f32.mrf.mxu0 }
 0x49b   :  { %v3206_v17 = vsel %vm1494_vm0, %v3194_v60, 0.0  ;;  %v3195_v30 = vmul.f32 %v5964_v47, %v5964_v47  ;;  %v3172_v39 = vsel %vm1494_vm0, %v5971_v31, 0.0  ;;  %v3196_v54 = vmul.f32 %v5971_v31, %v5971_v31 }
 0x49c   :  { %v3154_v32 = vrot.slane %v3153_v25, 2  ;;  %v3201_v61 = vadd.f32 %v3200_v26, %v3199_v23  ;;  %v3160_v34 = vadd.f32 %v3159_v27, %v3158_v24  ;;  %v3207_v35 = vrot.slane %v3206_v17, 4  ;;  %v3059_v45 = vpop.f32.mrf.mxu1  ;;  %v3099_v40 = vpop.f32.mrf.mxu0  ;;  %v5980_v26 = vld [vmem:[#allocation5 + $0x10] sm:$0xff] }
 0x49d   :  { %v3167_v36 = vadd.f32 %v3166_v29, %v3165_v14  ;;  %v3213_v38 = vsel %vm1494_vm0, %v3195_v30, 0.0  ;;  %v3173_v48 = vrot.slane %v3172_v39, 4  ;;  %v3220_v49 = vsel %vm1494_vm0, %v3196_v54, 0.0  ;;  %v5983_v29 = vld [vmem:[#allocation5 + $0x28] sm:$0xff] }
 0x49e   :  { %v3155_v43 = vadd.f32 %v3154_v32, %v3153_v25  ;;  %v3202_v55 = vrot.slane %v3201_v61, 2  ;;  %v3161_v1 = vrot.slane %v3160_v34, 2  ;;  %v3208_v33 = vadd.f32 %v3207_v35, %v3206_v17  ;;  %v3100_v51 = vpop.f32.mrf.mxu0 }
 0x49f   :  { %v3168_v11 = vrot.slane %v3167_v36, 2  ;;  %v3214_v46 = vrot.slane %v3213_v38, 4  ;;  %v3221_v57 = vrot.slane %v3220_v49, 4  ;;  %v3174_v63 = vadd.f32 %v3173_v48, %v3172_v39 }
 0x4a0   :  { %v3203_v53 = vadd.f32 %v3202_v55, %v3201_v61  ;;  %v3209_v8 = vrot.slane %v3208_v33, 2  ;;  %v3162_v58 = vadd.f32 %v3161_v1, %v3160_v34  ;;  %v3156_v41 = vrot.slane %v3155_v43, 1  ;;  %v5989_v34 = vld [vmem:[#allocation5 + $0x20] sm:$0xff] }
 0x4a1   :  { %v3169_v59 = vadd.f32 %v3168_v11, %v3167_v36  ;;  %v3215_v62 = vadd.f32 %v3214_v46, %v3213_v38  ;;  %v3222_v42 = vadd.f32 %v3221_v57, %v3220_v49  ;;  %v3175_v4 = vrot.slane %v3174_v63, 2 }
 0x4a2   :  { %v3163_v0 = vrot.slane %v3162_v58, 1  ;;  %v3210_v2 = vadd.f32 %v3209_v8, %v3208_v33  ;;  %v3204_v37 = vrot.slane %v3203_v53, 1  ;;  %v3157_v21 = vadd.f32 %v3156_v41, %v3155_v43 }
 0x4a3   :  { %v3216_v3 = vrot.slane %v3215_v62, 2  ;;  %v3170_v5 = vrot.slane %v3169_v59, 1  ;;  %v3223_v52 = vrot.slane %v3222_v42, 2  ;;  %v3176_v10 = vadd.f32 %v3175_v4, %v3174_v63 }
 0x4a4   :  { %v3211_v6 = vrot.slane %v3210_v2, 1  ;;  %v3205_v9 = vadd.f32 %v3204_v37, %v3203_v53  ;;  %v3164_v13 = vadd.f32 %v3163_v0, %v3162_v58 }
 0x4a5   :  { %v3217_v7 = vadd.f32 %v3216_v3, %v3215_v62  ;;  %v3224_v20 = vadd.f32 %v3223_v52, %v3222_v42  ;;  %v3177_v23 = vrot.slane %v3176_v10, 1  ;;  %v3171_v24 = vadd.f32 %v3170_v5, %v3169_v59 }
 0x4a6   :  { %v3212_v19 = vadd.f32 %v3211_v6, %v3210_v2  ;;  %v3241_v28 = vsel %vm1645_vm1, %v3157_v21, %v3205_v9 }
 0x4a7   :  { %v3218_v60 = vrot.slane %v3217_v7, 1  ;;  %v3225_v27 = vrot.slane %v3224_v20, 1  ;;  %v3178_v14 = vadd.f32 %v3177_v23, %v3176_v10 }
 0x4a8   :  { %v3242_v25 = vsel %vm1645_vm1, %v3164_v13, %v3212_v19 }
 0x4a9   :  { %3311 = vmatprep.mubr.f32.mxu0 %v3242_v25  ;;  %v3219_v17 = vadd.f32 %v3218_v60, %v3217_v7  ;;  %v3226_v30 = vadd.f32 %v3225_v27, %v3224_v20 }
 0x4aa   :  { %3312 = vmatmul.mubr.f32.vlgmr.msra.gmra.mxu0 %v3241_v28 }
 0x4ab   :  { %3348 = vmatpush1.xpose.msra.mxu0 %v5980_v26  ;;  %v3243_v32 = vsel %vm1645_vm1, %v3171_v24, %v3219_v17  ;;  %v3244_v61 = vsel %vm1645_vm1, %v3178_v14, %v3226_v30 }
 0x4ac   :  { %3417 = vmatprep.subr.mxu0 %v5983_v29  ;;  %3381 = vmatprep.mubr.f32.mxu0 %v3244_v61 }
 0x4ae   :  { %3382 = vmatmul.mubr.f32.vlgmr.msra.gmra.mxu0 %v3243_v32 }
 0x4af   :  { %3418 = vmatpush1.xpose.msra.mxu0 %v5989_v34 }
 0x4b0   :  { %3510 = vmatprep.subr.mxu0 %v5942_v15 }
 0x4d6   :  { %v5993_v35 = vpop.f32.mrf.mxu1 }
 0x4d7   :  { %v3179_v45 = vsel %vm1494_vm0, %v5993_v35, 0.0  ;;  %v3197_v36 = vmul.f32 %v5993_v35, %v5993_v35 }
 0x4d8   :  { %v3180_v38 = vrot.slane %v3179_v45, 4  ;;  %v5999_v39 = vpop.f32.mrf.mxu1 }
 0x4d9   :  { %v3227_v54 = vsel %vm1494_vm0, %v3197_v36, 0.0  ;;  %v3186_v40 = vsel %vm1494_vm0, %v5999_v39, 0.0  ;;  %v3198_v43 = vmul.f32 %v5999_v39, %v5999_v39 }
 0x4da   :  { %v3181_v15 = vadd.f32 %v3180_v38, %v3179_v45  ;;  %v3228_v55 = vrot.slane %v3227_v54, 4  ;;  %v3187_v1 = vrot.slane %v3186_v40, 4  ;;  %v3140_v33 = vpop.f32.mrf.mxu1 }
 0x4db   :  { %v3234_v11 = vsel %vm1494_vm0, %v3198_v43, 0.0 }
 0x4dc   :  { %v3182_v46 = vrot.slane %v3181_v15, 2  ;;  %v3229_v48 = vadd.f32 %v3228_v55, %v3227_v54  ;;  %v3188_v49 = vadd.f32 %v3187_v1, %v3186_v40  ;;  %v3235_v51 = vrot.slane %v3234_v11, 4  ;;  %v3141_v53 = vpop.f32.mrf.mxu1 }
 0x4de   :  { %v3230_v8 = vrot.slane %v3229_v48, 2  ;;  %v3189_v57 = vrot.slane %v3188_v49, 2  ;;  %v3236_v58 = vadd.f32 %v3235_v51, %v3234_v11  ;;  %v3183_v59 = vadd.f32 %v3182_v46, %v3181_v15 }
 0x4e0   :  { %v3231_v62 = vadd.f32 %v3230_v8, %v3229_v48  ;;  %v3237_v63 = vrot.slane %v3236_v58, 2  ;;  %v3190_v42 = vadd.f32 %v3189_v57, %v3188_v49  ;;  %v3184_v3 = vrot.slane %v3183_v59, 1 }
 0x4e2   :  { %v3191_v0 = vrot.slane %v3190_v42, 1  ;;  %v3238_v2 = vadd.f32 %v3237_v63, %v3236_v58  ;;  %v3232_v37 = vrot.slane %v3231_v62, 1  ;;  %v3185_v6 = vadd.f32 %v3184_v3, %v3183_v59 }
 0x4e4   :  { %v3239_v4 = vrot.slane %v3238_v2, 1  ;;  %v3233_v41 = vadd.f32 %v3232_v37, %v3231_v62  ;;  %v3192_v5 = vadd.f32 %v3191_v0, %v3190_v42 }
 0x4e6   :  { %v3240_v52 = vadd.f32 %v3239_v4, %v3238_v2  ;;  %v3245_v9 = vsel %vm1645_vm1, %v3185_v6, %v3233_v41 }
 0x4e8   :  { %v3246_v7 = vsel %vm1645_vm1, %v3192_v5, %v3240_v52 }
 0x4e9   :  { %3451 = vmatprep.mubr.f32.mxu0 %v3246_v7 }
 0x4ea   :  { %3452 = vmatmul.mubr.f32.vlgmr.msra.gmra.mxu0 %v3245_v9 }
 0x4eb   :  { %3511 = vmatpush1.msra.mxu0 %v5944_v16  ;;  %3544 = vmatprep.mubr.f32.mxu0 %v5500_v12  ;;  %v3149_v16 = vld [vmem:[#allocation5 + $0x30] ss:$0 sm:$0xff] }
 0x4ec   :  { %3581 = vmatprep.subr.mxu0 %v5948_v18  ;;  %v3150_v18 = vld [vmem:[#allocation5 + $0x31] ss:$0 sm:$0xff] }
 0x56a   :  { %v3313_v10 = vpop.f32.mrf.mxu0 }
 0x56c   :  { %v3315_v13 = vpop.f32.mrf.mxu0 }
 0x56e   :  { %v3383_v19 = vpop.f32.mrf.mxu0 }
 0x56f   :  { %v3384_v21 = vadd.f32 %v3383_v19, %v3313_v10 }
 0x570   :  { %v3385_v20 = vpop.f32.mrf.mxu0 }
 0x5aa   :  { %v3453_v23 = vpop.f32.mrf.mxu0 }
 0x5ab   :  { %v3454_v24 = vadd.f32 %v3453_v23, %v3384_v21 }
 0x5ac   :  { %v3455_v60 = vpop.f32.mrf.mxu0 }
 0x5ad   :  { %v3457_v25 = vmul.f32 0.0061728396, %v3454_v24 }
 0x5af   :  { %v3458_v27 = vmul.f32 %v3457_v25, %v3457_v25 }
 0x5b1   :  { %v3460_v28 = vrot.slane %v3458_v27, 7 }
 0x5b3   :  { %v3462_v14 = vsub.f32 %v3457_v25, %v3460_v28 }
 0x5b5   :  { %v3463_v17 = vmax.f32 %v3462_v14, 0.0 }
 0x5b7   :  { %v3464_v30 = vadd.f32 1e-05, %v3463_v17 }
 0x5b9   :  { %5364 = vrsqrt.f32 %v3464_v30 }
 0x5c6   :  { %v5365_v32 = vpop.eup %5364 }
 0x5c7   :  { %v3466_v61 = vmul.f32 %v5365_v32, %v3149_v16 }
 0x5c9   :  { %v3468_v45 = vrot.slane %v3466_v61, 1 }
 0x5cb   :  { %v3470_v36 = vmul.f32 %v3468_v45, %v3457_v25 }
 0x5cd   :  { %v3471_v38 = vsub.f32 %v3150_v18, %v3470_v36 }
 0x5cf   :  { %v3473_v54 = vrot.slane %v3471_v38, 7 }
 0x5d1   :  { %v3475_v40 = vsel %vm1645_vm1, %v3468_v45, %v3473_v54 }
 0x5d2   :  { %4814 = vmatmul.mubr.msk.f32.vlgmr.msra.gmra.mxu0 %vm3476_vm4, %v3475_v40 }
 0x5d3   :  { %3582 = vmatpush1.msra.mxu0 %v5980_v26  ;;  %3615 = vmatprep.mubr.f32.mxu0 %v5500_v12 }
 0x5d4   :  { %3652 = vmatprep.subr.mxu0 %v5983_v29 }
 0x5d6   :  { %4815 = vmatmul.mubr.msk.f32.vlgmr.msra.gmra.mxu0 %vm3476_vm4, %v3475_v40 }
 0x5d7   :  { %3653 = vmatpush1.msra.mxu0 %v5989_v34  ;;  %3686 = vmatprep.mubr.f32.mxu0 %v5500_v12 }
 0x5da   :  { %4816 = vmatmul.mubr.msk.f32.vlgmr.msra.gmra.mxu0 %vm3476_vm4, %v3475_v40 }
 0x692   :  { %v3546_v43 = vpop.f32.mrf.mxu0 }
 0x693   :  { %v3696_v15 = vrot.slane %v3546_v43, %v5900_v50  ;;  %v3726_v33 = vrot.slane %v3546_v43, %v5905_v44 }
 0x694   :  { %v3548_v55 = vpop.f32.mrf.mxu0 }
 0x695   :  { %v3717_v1 = vmul.f32 %v3696_v15, %v5951_v56  ;;  %v3700_v26 = vrot.slane %v3548_v55, %v5900_v50  ;;  %v3730_v34 = vrot.slane %v3548_v55, %v5905_v44 }
 0x696   :  { %v3617_v11 = vpop.f32.mrf.mxu0 }
 0x697   :  { %v6022_v46 = vadd.f32 %v3726_v33, %v3717_v1  ;;  %v3718_v29 = vmul.f32 %v3700_v26, %v5957_v22  ;;  %v3704_v48 = vrot.slane %v3617_v11, %v5900_v50  ;;  %v3734_v49 = vrot.slane %v3617_v11, %v5905_v44 }
 0x698   :  { %v3619_v51 = vpop.f32.mrf.mxu0 }
 0x699   :  { %v3753_v53 = vmax.f32 %v6022_v46, 0.0  ;;  %v3748_v8 = vadd.f32 %v3730_v34, %v3718_v29  ;;  %v3719_v56 = vmul.f32 %v3704_v48, %v5964_v47  ;;  %v3708_v57 = vrot.slane %v3619_v51, %v5900_v50 }
 0x69a   :  { %v3738_v58 = vrot.slane %v3619_v51, %v5905_v44  ;;  %v3688_v59 = vpop.f32.mrf.mxu0 }
 0x69b   :  { %v3754_v62 = vmax.f32 %v3748_v8, 0.0  ;;  %v6032_v63 = vadd.f32 %v3734_v49, %v3719_v56  ;;  %v3720_v22 = vmul.f32 %v3708_v57, %v5971_v31  ;;  %v3712_v42 = vrot.slane %v3688_v59, %v5900_v50 }
 0x69c   :  { %v3742_v0 = vrot.slane %v3688_v59, %v5905_v44  ;;  %v3690_v2 = vpop.f32.mrf.mxu0 }
 0x69d   :  { %v3755_v37 = vmax.f32 %v6032_v63, 0.0  ;;  %v3750_v3 = vadd.f32 %v3738_v58, %v3720_v22  ;;  %v3721_v47 = vmul.f32 %v3712_v42, %v5993_v35  ;;  %v3716_v4 = vrot.slane %v3690_v2, %v5900_v50 }
 0x69e   :  { %v3746_v6 = vrot.slane %v3690_v2, %v5905_v44 }
 0x69f   :  { %v3756_v41 = vmax.f32 %v3750_v3, 0.0  ;;  %v6040_v5 = vadd.f32 %v3742_v0, %v3721_v47  ;;  %v3722_v52 = vmul.f32 %v3716_v4, %v5999_v39 }
 0x6a1   :  { %v3757_v31 = vmax.f32 %v6040_v5, 0.0  ;;  %v6045_v7 = vadd.f32 %v3746_v6, %v3722_v52 }
 0x6a3   :  { %v3758_v9 = vmax.f32 %v6045_v7, 0.0 }
 0x6a4   :  { %5490 = dma.done.wait [#allocation6 + $0x2], 6144 }
 0x6a5   :  { %5491 = vsyncadd [#allocation6 + $0x2], 4294961152  ;;  %v3860_v10 = vpack.c.bf16 %v3754_v62, %v3754_v62  ;;  %v3862_v13 = vpack.c.bf16 %v3756_v41, %v3756_v41  ;;  %v5366_v50 = vld [vmem:[#allocation3 + $0x78] sm:$0xff]   ;;  %v5370_v44 = vld [vmem:[#allocation3 + $0x70] sm:$0xff]   ;;  %v3859_v29 = vpack.c.bf16 %v3753_v53, %v3753_v53  ;;  %v3861_v34 = vpack.c.bf16 %v3755_v37, %v3755_v37 }
 0x6a6   :  { %v5367_v35 = vld [vmem:[#allocation3 + $0xf8] sm:$0xff]   ;;  %4877 = vmatprep.subr.bf16.mxu0 %v5366_v50  ;;  %v5371_v20 = vld [vmem:[#allocation3 + $0xf0] sm:$0xff]   ;;  %v5374_v24 = vld [vmem:[#allocation3 + $0x68] sm:$0xff]   ;;  %v3864_v51 = vpack.c.bf16 %v3758_v9, %v3758_v9  ;;  %v3863_v3 = vpack.c.bf16 %v3757_v31, %v3757_v31  ;;  %vm4275_vm5 = vcmask 517120  }
 0x6a7   :  { %4185 = vmatprep.mubr.bf16.mxu0 %v3860_v10  ;;  %4225 = vmatprep.mubr.bf16.mxu1 %v3862_v13  ;;  %v5368_v19 = vld [vmem:[#allocation3 + $0x38] sm:$0xff]   ;;  %v5372_v21 = vld [vmem:[#allocation3 + $0x30] sm:$0xff]   ;;  %v5375_v60 = vld [vmem:[#allocation3 + $0xe8] sm:$0xff]  }
 0x6a8   :  { %4899 = vmatprep.subr.bf16.mxu1 %v5367_v35  ;;  %v5369_v39 = vld [vmem:[#allocation3 + $0xb8] sm:$0xff]   ;;  %4878 = vmatpush3.bf16.msra.mxu0 %v5368_v19  ;;  %v5373_v23 = vld [vmem:[#allocation3 + $0xb0] sm:$0xff]   ;;  %v5376_v25 = vld [vmem:[#allocation3 + $0x28] sm:$0xff]  }
 0x6a9   :  { %4900 = vmatpush3.bf16.msra.mxu1 %v5369_v39  ;;  %4879 = vmatprep.subr.bf16.mxu0 %v5370_v44  ;;  %v5377_v27 = vld [vmem:[#allocation3 + $0xa8] sm:$0xff]   ;;  %v5378_v28 = vld [vmem:[#allocation3 + $0x60] sm:$0xff]   ;;  %v5382_v16 = vld [vmem:[#allocation3 + $0x58] sm:$0xff]  }
 0x6aa   :  { %4901 = vmatprep.subr.bf16.mxu1 %v5371_v20  ;;  %v5379_v14 = vld [vmem:[#allocation3 + $0xe0] sm:$0xff]   ;;  %v5383_v32 = vld [vmem:[#allocation3 + $0xd8] sm:$0xff]   ;;  %v5386_v18 = vld [vmem:[#allocation3 + $0x50] sm:$0xff]  }
 0x6ab   :  { %v5380_v17 = vld [vmem:[#allocation3 + $0x20] sm:$0xff]   ;;  %v5384_v61 = vld [vmem:[#allocation3 + $0x18] sm:$0xff]   ;;  %v5387_v36 = vld [vmem:[#allocation3 + $0xd0] sm:$0xff]  }
 0x6ac   :  { %4880 = vmatpush3.bf16.msra.mxu0 %v5372_v21  ;;  %v5381_v30 = vld [vmem:[#allocation3 + $0xa0] sm:$0xff]   ;;  %v5385_v45 = vld [vmem:[#allocation3 + $0x98] sm:$0xff]   ;;  %v5388_v38 = vld [vmem:[#allocation3 + $0x10] sm:$0xff]  }
 0x6ad   :  { %4902 = vmatpush3.bf16.msra.mxu1 %v5373_v23  ;;  %4881 = vmatprep.subr.bf16.mxu0 %v5374_v24  ;;  %v5389_v54 = vld [vmem:[#allocation3 + $0x90] sm:$0xff]   ;;  %v5390_v40 = vld [vmem:[#allocation3 + $0x48] sm:$0xff]   ;;  %v5394_v1 = vld [vmem:[#allocation3 + $0x40] sm:$0xff]  }
 0x6ae   :  { %4903 = vmatprep.subr.bf16.mxu1 %v5375_v60  ;;  %v5391_v43 = vld [vmem:[#allocation3 + $0xc8] sm:$0xff]   ;;  %v5395_v33 = vld [vmem:[#allocation3 + $0xc0] sm:$0xff]   ;;  %v5398_v48 = vld [vmem:[#allocation3 + $0x178] sm:$0xff]  }
 0x6af   :  { %v5392_v15 = vld [vmem:[#allocation3 + $0x8] sm:$0xff]   ;;  %v5396_v26 = vld [vmem:[#allocation3] sm:$0xff]   ;;  %v5399_v49 = vld [vmem:[#allocation3 + $0x138] sm:$0xff]  }
 0x6b0   :  { %4882 = vmatpush3.bf16.msra.mxu0 %v5376_v25  ;;  %v5393_v55 = vld [vmem:[#allocation3 + $0x88] sm:$0xff]   ;;  %v5397_v11 = vld [vmem:[#allocation3 + $0x80] sm:$0xff]   ;;  %v5400_v8 = vld [vmem:[#allocation3 + $0x170] sm:$0xff]  }
 0x6b1   :  { %4904 = vmatpush3.bf16.msra.mxu1 %v5377_v27  ;;  %4883 = vmatprep.subr.bf16.mxu0 %v5378_v28  ;;  %v5401_v46 = vld [vmem:[#allocation3 + $0x130] sm:$0xff]   ;;  %v5402_v53 = vld [vmem:[#allocation3 + $0x168] sm:$0xff]   ;;  %v5404_v57 = vld [vmem:[#allocation3 + $0x160] sm:$0xff]  }
 0x6b2   :  { %4905 = vmatprep.subr.bf16.mxu1 %v5379_v14  ;;  %v5403_v56 = vld [vmem:[#allocation3 + $0x128] sm:$0xff]   ;;  %v5405_v58 = vld [vmem:[#allocation3 + $0x120] sm:$0xff]   ;;  %v5406_v59 = vld [vmem:[#allocation3 + $0x158] sm:$0xff]  }
 0x6b3   :  { %v5407_v62 = vld [vmem:[#allocation3 + $0x118] sm:$0xff]   ;;  %v5408_v63 = vld [vmem:[#allocation3 + $0x150] sm:$0xff]   ;;  %v5410_v42 = vld [vmem:[#allocation3 + $0x148] sm:$0xff]  }
 0x6b4   :  { %4884 = vmatpush3.bf16.msra.mxu0 %v5380_v17  ;;  %v5409_v22 = vld [vmem:[#allocation3 + $0x110] sm:$0xff]   ;;  %v5411_v0 = vld [vmem:[#allocation3 + $0x108] sm:$0xff]   ;;  %v5412_v2 = vld [vmem:[#allocation3 + $0x140] sm:$0xff]  }
 0x6b5   :  { %4906 = vmatpush3.bf16.msra.mxu1 %v5381_v30  ;;  %4885 = vmatprep.subr.bf16.mxu0 %v5382_v16  ;;  %v5413_v37 = vld [vmem:[#allocation3 + $0x100] sm:$0xff]  }
 0x6b6   :  { %4907 = vmatprep.subr.bf16.mxu1 %v5383_v32 }
 0x6b8   :  { %4886 = vmatpush3.bf16.msra.mxu0 %v5384_v61 }
 0x6b9   :  { %4908 = vmatpush3.bf16.msra.mxu1 %v5385_v45  ;;  %4887 = vmatprep.subr.bf16.mxu0 %v5386_v18 }
 0x6ba   :  { %4909 = vmatprep.subr.bf16.mxu1 %v5387_v36 }
 0x6bc   :  { %4888 = vmatpush3.bf16.msra.mxu0 %v5388_v38 }
 0x6bd   :  { %4910 = vmatpush3.bf16.msra.mxu1 %v5389_v54  ;;  %4889 = vmatprep.subr.bf16.mxu0 %v5390_v40 }
 0x6be   :  { %4911 = vmatprep.subr.bf16.mxu1 %v5391_v43 }
 0x6c0   :  { %4890 = vmatpush3.bf16.msra.mxu0 %v5392_v15 }
 0x6c1   :  { %4912 = vmatpush3.bf16.msra.mxu1 %v5393_v55  ;;  %4891 = vmatprep.subr.bf16.mxu0 %v5394_v1  ;;  %v4273_v55 = vld [vmem:[#allocation5 + $0x32] ss:$0 sm:$0xff] }
 0x6c2   :  { %4913 = vmatprep.subr.bf16.mxu1 %v5395_v33 }
 0x6c4   :  { %4892 = vmatpush3.bf16.msra.mxu0 %v5396_v26  ;;  %v4274_v26 = vld [vmem:[#allocation5 + $0x33] ss:$0 sm:$0xff] }
 0x6c5   :  { %4914 = vmatpush3.bf16.msra.mxu1 %v5397_v11  ;;  %4921 = vmatprep.subr.bf16.mxu0 %v5398_v48 }
 0x6c7   :  { %4186 = vmatmul.mubr.bf16.vlgmr.msra.gmra.mxu0 %v3859_v29 }
 0x6c8   :  { %4226 = vmatmul.mubr.bf16.vlgmr.msra.gmra.mxu1 %v3861_v34  ;;  %4922 = vmatpush3.bf16.msra.mxu0 %v5399_v49 }
 0x6c9   :  { %4923 = vmatprep.subr.bf16.mxu0 %v5400_v8  ;;  %4265 = vmatprep.mubr.bf16.mxu0 %v3864_v51 }
 0x6cc   :  { %4924 = vmatpush3.bf16.msra.mxu0 %v5401_v46 }
 0x6cd   :  { %4925 = vmatprep.subr.bf16.mxu0 %v5402_v53 }
 0x6d0   :  { %4926 = vmatpush3.bf16.msra.mxu0 %v5403_v56 }
 0x6d1   :  { %4927 = vmatprep.subr.bf16.mxu0 %v5404_v57 }
 0x6d4   :  { %4928 = vmatpush3.bf16.msra.mxu0 %v5405_v58 }
 0x6d5   :  { %4929 = vmatprep.subr.bf16.mxu0 %v5406_v59 }
 0x6d8   :  { %4930 = vmatpush3.bf16.msra.mxu0 %v5407_v62 }
 0x6d9   :  { %4931 = vmatprep.subr.bf16.mxu0 %v5408_v63 }
 0x6dc   :  { %4932 = vmatpush3.bf16.msra.mxu0 %v5409_v22 }
 0x6dd   :  { %4933 = vmatprep.subr.bf16.mxu0 %v5410_v42 }
 0x6e0   :  { %4934 = vmatpush3.bf16.msra.mxu0 %v5411_v0 }
 0x6e1   :  { %4935 = vmatprep.subr.bf16.mxu0 %v5412_v2 }
 0x6e4   :  { %4936 = vmatpush3.bf16.msra.mxu0 %v5413_v37 }
 0x6e7   :  { %4266 = vmatmul.mubr.bf16.vlgmr.msra.gmra.mxu0 %v3863_v3 }
 0x787   :  { %v4893_v47 = vpop.f32.mrf.mxu0 }
 0x788   :  { %v4915_v4 = vpop.f32.mrf.mxu1 }
 0x789   :  { %v4894_v41 = vpop.f32.mrf.mxu0 }
 0x78a   :  { %v4916_v52 = vpop.f32.mrf.mxu1  ;;  %v4895_v13 = vadd.f32 %v4894_v41, %v4893_v47 }
 0x78b   :  { %v4896_v6 = vpop.f32.mrf.mxu0  ;;  %v4917_v50 = vadd.f32 %v4916_v52, %v4915_v4 }
 0x78c   :  { %v4918_v7 = vpop.f32.mrf.mxu1 }
 0x78d   :  { %v4897_v9 = vpop.f32.mrf.mxu0  ;;  %v4228_v39 = vadd.f32 %v4917_v50, %v4895_v13 }
 0x78e   :  { %v4919_v10 = vpop.f32.mrf.mxu1 }
 0x7a7   :  { %v4937_v35 = vpop.f32.mrf.mxu0 }
 0x7a9   :  { %v4938_v19 = vpop.f32.mrf.mxu0 }
 0x7aa   :  { %v4939_v44 = vadd.f32 %v4938_v19, %v4937_v35 }
 0x7ab   :  { %v4940_v5 = vpop.f32.mrf.mxu0 }
 0x7ac   :  { %v4268_v20 = vadd.f32 %v4939_v44, %v4228_v39 }
 0x7ad   :  { %v4941_v31 = vpop.f32.mrf.mxu0 }
 0x7ae   :  { %v4276_v21 = vsel %vm4275_vm5, %v4268_v20, 0.0  ;;  %v4284_v23 = vmul.f32 %v4268_v20, %v4268_v20 }
 0x7af   :  { %v4277_v24 = vrot.slane %v4276_v21, 4 }
 0x7b0   :  { %v4285_v60 = vsel %vm4275_vm5, %v4284_v23, 0.0 }
 0x7b1   :  { %v4278_v25 = vadd.f32 %v4277_v24, %v4276_v21  ;;  %v4286_v27 = vrot.slane %v4285_v60, 4 }
 0x7b3   :  { %v4279_v28 = vrot.slane %v4278_v25, 2  ;;  %v4287_v14 = vadd.f32 %v4286_v27, %v4285_v60 }
 0x7b5   :  { %v4280_v17 = vadd.f32 %v4279_v28, %v4278_v25  ;;  %v4288_v30 = vrot.slane %v4287_v14, 2 }
 0x7b7   :  { %v4281_v16 = vrot.slane %v4280_v17, 1  ;;  %v4289_v32 = vadd.f32 %v4288_v30, %v4287_v14 }
 0x7b9   :  { %v4282_v61 = vadd.f32 %v4281_v16, %v4280_v17  ;;  %v4290_v45 = vrot.slane %v4289_v32, 1 }
 0x7bb   :  { %v4283_v18 = vmul.f32 0.5, %v4282_v61  ;;  %v4291_v36 = vadd.f32 %v4290_v45, %v4289_v32 }
 0x7bd   :  { %v4292_v38 = vmul.f32 0.5, %v4291_v36  ;;  %v4293_v54 = vmul.f32 %v4283_v18, %v4283_v18 }
 0x7bf   :  { %v4294_v40 = vsub.f32 %v4292_v38, %v4293_v54 }
 0x7c1   :  { %v4295_v43 = vmax.f32 %v4294_v40, 0.0 }
 0x7c3   :  { %v4296_v15 = vadd.f32 1e-05, %v4295_v43 }
 0x7c5   :  { %5414 = vrsqrt.f32 %v4296_v15 }
 0x7d2   :  { %v5415_v1 = vpop.eup %5414 }
 0x7d3   :  { %v4298_v33 = vmul.f32 %v5415_v1, %v4273_v55 }
 0x7d5   :  { %v4300_v11 = vmul.f32 %v4298_v33, %v4283_v18  ;;  %v4299_v29 = vmul.f32 %v4298_v33, %v4268_v20 }
 0x7d7   :  { %v4301_v34 = vsub.f32 %v4274_v26, %v4300_v11 }
 0x7d9   :  { %v4302_v48 = vadd.f32 %v4301_v34, %v4299_v29 }
 0x7db   :  { %v4303_v49 = vmax.f32 %v4302_v48, 0.0 }
 0x7dc   :  { %5492 = dma.done.wait [#allocation6 + $0x3], 768 }
 0x7dd   :  { %5493 = vsyncadd [#allocation6 + $0x3], 4294966528  ;;  %4951 = vmatprep.subr.bf16.mxu1 %v5500_v12  ;;  %vm5501_vm6 = vmmov 0   ;;  %v5416_v51 = vld [vmem:[#allocation4 + $0x18] sm:$0xff]   ;;  %v5417_v8 = vld [vmem:[#allocation4 + $0x10] sm:$0xff]   ;;  %v4316_v56 = vpack.c.bf16 %v4303_v49, %v4303_v49  ;;  %vm4341_vm7 = vcmask 523264  }
 0x7de   :  { %4959 = vmatprep.mubr.msk.bf16.mxu1 %vm5501_vm6, %v5500_v12  ;;  %4952 = vmatpush3.bf16.msra.mxu1 %v5416_v51  ;;  %v5418_v46 = vld [vmem:[#allocation4 + $0x8] sm:$0xff]   ;;  %v5419_v53 = vld [vmem:[#allocation4] sm:$0xff]   ;;  %vm4387_vm8 = vcmask 254976   ;;  %vm4434_vm9 = vcmask 261120   ;;  %s5502_s2 = smov [#allocation10]  }
 0x7df   :  { %4953 = vmatprep.subr.bf16.mxu1 %v5500_v12  ;;  %v5420_v57 = vld [vmem:[#allocation4 + $0x28] sm:$0xff]   ;;  %v5421_v58 = vld [vmem:[#allocation4 + $0x20] sm:$0xff]   ;;  %s4485_s25 = sshll.u32 %s5502_s2, 4  ;;  %s4486_s25 = int_to_ptr.vmem [resolvable:$true] %s4485_s25 }
 0x7e0   :  { %v4385_v20 = vld [vmem:[#allocation5 + $0x34] ss:$0 sm:$0xff]  ;;  %v4386_v23 = vld [vmem:[#allocation5 + $0x35] ss:$0 sm:$0xff]  ;;  %v4421_v17 = vld [vmem:[#allocation5 + $0x36] ss:$0 sm:$0xff]  ;;  %p5469_p11 = scmp.lt.s32.totalorder %s4486_s25, %s4486_s25 }
 0x7e1   :  { %s5464_s26 = scalar_lea.vmem %s4486_s25, 32 }
 0x7e2   :  { %4954 = vmatpush3.bf16.msra.mxu1 %v5417_v8  ;;  %p5465_p10 = scmp.ne.s32.totalorder %s4486_s25, %s5464_s26  ;;  %p5470_p12 = scmp.lt.s32.totalorder %s5464_s26, %s5464_s26 }
 0x7e3   :  { %4955 = vmatprep.subr.bf16.mxu1 %v5500_v12 }
 0x7e4   :  { %p5471_p13 = por %p5470_p12, %p5469_p11 }
 0x7e6   :  { %4956 = vmatpush3.bf16.msra.mxu1 %v5418_v46  ;;  %p5472_p0 = pnand %p5471_p13, %p5465_p10 }
 0x7e7   :  { %4957 = vmatprep.subr.bf16.mxu1 %v5500_v12 }
 0x7ea   :  { %4958 = vmatpush3.bf16.msra.mxu1 %v5419_v53 }
 0x7eb   :  { %4963 = vmatprep.subr.bf16.mxu1 %v5500_v12 }
 0x7ed   :  { %4960 = vmatmul.mubr.msk.bf16.vlgmr.msra.gmra.mxu1 %vm4341_vm7, %v4316_v56 }
 0x7ee   :  { %4967 = vmatprep.mubr.msk.bf16.mxu1 %vm5501_vm6, %v5500_v12  ;;  %4964 = vmatpush3.bf16.msra.mxu1 %v5420_v57 }
 0x7ef   :  { %4965 = vmatprep.subr.bf16.mxu1 %v5500_v12 }
 0x7f2   :  { %4966 = vmatpush3.bf16.msra.mxu1 %v5421_v58 }
 0x8ad   :  { %v4379_v59 = vpop.f32.mrf.mxu1 }
 0x8ae   :  { %v4388_v62 = vsel %vm4387_vm8, %v4379_v59, 0.0  ;;  %v4396_v63 = vmul.f32 %v4379_v59, %v4379_v59 }
 0x8af   :  { %v4389_v22 = vrot.slane %v4388_v62, 4  ;;  %v4961_v42 = vpop.f32.mrf.mxu1 }
 0x8b0   :  { %v4397_v0 = vsel %vm4387_vm8, %v4396_v63, 0.0 }
 0x8b1   :  { %v4390_v2 = vadd.f32 %v4389_v22, %v4388_v62  ;;  %v4398_v37 = vrot.slane %v4397_v0, 4  ;;  %v4382_v3 = vpop.f32.mrf.mxu1 }
 0x8b3   :  { %v4391_v47 = vrot.slane %v4390_v2, 2  ;;  %v4399_v4 = vadd.f32 %v4398_v37, %v4397_v0  ;;  %v4962_v41 = vpop.f32.mrf.mxu1 }
 0x8b5   :  { %v4392_v52 = vadd.f32 %v4391_v47, %v4390_v2  ;;  %v4400_v6 = vrot.slane %v4399_v4, 2 }
 0x8b7   :  { %v4393_v7 = vrot.slane %v4392_v52, 1  ;;  %v4401_v9 = vadd.f32 %v4400_v6, %v4399_v4 }
 0x8b9   :  { %v4394_v12 = vadd.f32 %v4393_v7, %v4392_v52  ;;  %v4402_v10 = vrot.slane %v4401_v9, 1 }
 0x8bb   :  { %v4395_v13 = vmul.f32 0.5, %v4394_v12  ;;  %v4403_v50 = vadd.f32 %v4402_v10, %v4401_v9 }
 0x8bd   :  { %v4404_v35 = vmul.f32 0.5, %v4403_v50  ;;  %v4405_v19 = vmul.f32 %v4395_v13, %v4395_v13 }
 0x8bf   :  { %v4406_v39 = vsub.f32 %v4404_v35, %v4405_v19 }
 0x8c1   :  { %v4407_v44 = vmax.f32 %v4406_v39, 0.0 }
 0x8c3   :  { %v4408_v5 = vadd.f32 1e-05, %v4407_v44 }
 0x8c5   :  { %5422 = vrsqrt.f32 %v4408_v5 }
 0x8d2   :  { %v5423_v31 = vpop.eup %5422 }
 0x8d3   :  { %v4410_v21 = vmul.f32 %v5423_v31, %v4385_v20 }
 0x8d5   :  { %v4412_v24 = vmul.f32 %v4410_v21, %v4395_v13  ;;  %v4411_v60 = vmul.f32 %v4410_v21, %v4379_v59 }
 0x8d7   :  { %v4413_v25 = vsub.f32 %v4386_v23, %v4412_v24 }
 0x8d9   :  { %v4414_v27 = vadd.f32 %v4413_v25, %v4411_v60 }
 0x8db   :  { %v4415_v28 = vmax.f32 %v4414_v27, 0.0 }
 0x8dd   :  { %v4420_v14 = vpack.c.bf16 %v4415_v28, %v4415_v28 }
 0x8df   :  { %4968 = vmatmul.mubr.msk.bf16.vlgmr.msra.gmra.mxu1 %vm4434_vm9, %v4420_v14 }
 0x99f   :  { %v4472_v30 = vpop.f32.mrf.mxu1 }
 0x9a0   :  { %v4473_v16 = vadd.f32 %v4472_v30, %v4421_v17 }
 0x9a1   :  { %v4969_v32 = vpop.f32.mrf.mxu1 }
 0x9a2   :  { %4478 = vst [vmem:[#allocation10] sm:$0x3] %v4473_v16 }
 0x9a3   :  { %v4475_v61 = vpop.f32.mrf.mxu1 }
 0x9a4   :  { %5475 = shalt.err (!%p5472_p0)
}
 0x9a5   :  { %4488 = dma.vmem_to_hbm [thread:$0]  %s4486_s25, 32, %s6080_s7, [#allocation9]   ;;  %v4970_v45 = vpop.f32.mrf.mxu1 }
 0x9a6   :  { %5494 = dma.done.wait [#allocation9], 32  }
 0x9a7   :  { %5495 = vsyncadd [#allocation9], 4294967264 }
 0x9a8   :  { %4492 = vsyncpa [#allocation8], 1 }
 0x9a9   :  { %4493 = vsyncpa [#allocation9], 1 }
 0x9aa   :  { %4494 = vsyncmov [#allocation6] }
 0x9ad   :  { %s4495_s28 = vpop.sfrf %4494 }
 0x9ae   :  { %p4873_p1 = scmp.ne.s32.totalorder %s4495_s28, 0 }
 0x9b0   :  { %4499 = shalt.err (%p4873_p1)  }
 0x9b1   :  { %4501 = vsyncmov [#allocation6 + $0x1] }
 0x9b4   :  { %s4502_s0 = vpop.sfrf %4501 }
 0x9b5   :  { %p4874_p2 = scmp.ne.s32.totalorder %s4502_s0, 0 }
 0x9b7   :  { %4506 = shalt.err (%p4874_p2)  }
 0x9b8   :  { %4508 = vsyncmov [#allocation6 + $0x2] }
 0x9bb   :  { %s4509_s29 = vpop.sfrf %4508 }
 0x9bc   :  { %p4875_p3 = scmp.ne.s32.totalorder %s4509_s29, 0 }
 0x9be   :  { %4513 = shalt.err (%p4875_p3)  }
 0x9bf   :  { %4515 = vsyncmov [#allocation6 + $0x3] }
 0x9c2   :  { %s4516_s30 = vpop.sfrf %4515 }
 0x9c3   :  { %p4876_p4 = scmp.ne.s32.totalorder %s4516_s30, 0 }
 0x9c5   :  { %4520 = shalt.err (%p4876_p4)  }

</bundles_post_ra>
